<compile_context>
chip_gen: v7x
topology: tpu7x:2x2x1
jax: 0.10.0
libtpu: 0.0.40
codegen_flags: <defaults>
</compile_context>

<pallas_src>
import numpy as np

import jax
import jax.numpy as jnp
from jax.experimental import pallas as pl
from jax.experimental.pallas import tpu as pltpu

LANES = 128  # lane-dense padding target for every channelized dimension

# ---- weight-blob layout (block indices into the (28, 128, 128) blob) ------
_T1, _T2, _F1, _F2, _F3, _BIAS = 0, 10, 20, 25, 26, 27
_NBLK = 28
# bias rows inside block _BIAS
_B1, _B2, _BF1, _BF2, _BF3 = 0, 1, 2, 3, 4


# ------------------------------ fused kernel -------------------------------

def _lenet_kernel(x_ref, w_ref, out_ref,
                  x2d_ref, c1_ref, p1_ref, c2_ref, p2_ref):
    f32 = jnp.float32

    def bias(row):                                   # (1, 128) bias row
        return w_ref[_BIAS, pl.ds(row, 1), :]

    # ---- input relayout (in-kernel so the jitted graph is ONE op) ---------
    # NCHW -> rows = image row, lanes = ci*32 + w; pad lanes zeroed so that
    # nothing (incl. NaN scratch garbage) leaks through the zero Toeplitz rows.
    x2d_ref[...] = jnp.zeros((32, LANES), f32)
    for c in range(3):
        x2d_ref[:, pl.ds(c * 32, 32)] = x_ref[0, c]

    def conv_wpool(src_ref, n_rows, t_off):
        # 5x5 "valid" conv as 5 accumulated Toeplitz matmuls per output-column
        # parity.  Each kh window is loaded ONCE and feeds both parity
        # accumulators; their elementwise max is the W-half of the 2x2 pool.
        acc_e = jnp.zeros((n_rows, LANES), f32)
        acc_o = jnp.zeros((n_rows, LANES), f32)
        for kh in range(5):
            win = src_ref[pl.ds(kh, n_rows), :]
            acc_e = acc_e + jnp.dot(win, w_ref[t_off + kh],
                                    preferred_element_type=f32)
            acc_o = acc_o + jnp.dot(win, w_ref[t_off + 5 + kh],
                                    preferred_element_type=f32)
        return jnp.maximum(acc_e, acc_o)

    def hpool_bias_relu(c_ref, n_half, b_row):
        # H-half of the 2x2 pool: one strided even/odd row max (no per-row
        # stores), then bias + ReLU applied once on the pooled rows
        # (equivalent to torch's pool(relu(conv + b)) since all commute).
        even = c_ref[pl.ds(0, n_half, stride=2), :]
        odd = c_ref[pl.ds(1, n_half, stride=2), :]
        return jnp.maximum(jnp.maximum(even, odd) + b_row, 0.0)

    # conv1 -> relu -> pool : lanes = (pooled_col * 6 + c_out)
    c1_ref[...] = conv_wpool(x2d_ref, 28, _T1)
    p1_ref[...] = hpool_bias_relu(c1_ref, 14, bias(_B1))

    # conv2 -> relu -> pool : lanes = (pooled_col * 16 + c_out)
    c2_ref[...] = conv_wpool(p1_ref, 10, _T2)
    p2_ref[...] = hpool_bias_relu(c2_ref, 5, bias(_B2))

    # fc1: contraction split over the 5 pooled rows; the permutation from
    # torch's (c, h, w) flatten order is baked into the packed weights, so no
    # runtime transpose/flatten is needed.
    acc = jnp.zeros((1, LANES), f32)
    for h in range(5):
        acc = acc + jnp.dot(p2_ref[pl.ds(h, 1), :], w_ref[_F1 + h],
                            preferred_element_type=f32)
    h1 = jnp.maximum(acc + bias(_BF1), 0.0)
    h2 = jnp.maximum(jnp.dot(h1, w_ref[_F2], preferred_element_type=f32)
                     + bias(_BF2), 0.0)
    y = jnp.dot(h2, w_ref[_F3], preferred_element_type=f32) + bias(_BF3)
    out_ref[...] = y[:, :10]


def _fused_lenet(x_nchw, blob):
    b = x_nchw.shape[0]
    return pl.pallas_call(
        _lenet_kernel,
        out_shape=jax.ShapeDtypeStruct((b, 10), jnp.float32),
        grid=(b,),
        in_specs=[pl.BlockSpec((1, 3, 32, 32), lambda i: (i, 0, 0, 0)),
                  pl.BlockSpec((_NBLK, LANES, LANES), lambda i: (0, 0, 0))],
        out_specs=pl.BlockSpec((1, 10), lambda i: (i, 0)),
        scratch_shapes=[pltpu.VMEM((32, LANES), jnp.float32),   # packed image
                        pltpu.VMEM((28, LANES), jnp.float32),   # conv1 (W-pooled)
                        pltpu.VMEM((14, LANES), jnp.float32),   # pool1
                        pltpu.VMEM((10, LANES), jnp.float32),   # conv2 (W-pooled)
                        pltpu.VMEM((5, LANES), jnp.float32)],   # pool2
        compiler_params=pltpu.CompilerParams(
            dimension_semantics=("parallel",)),
    )(x_nchw, blob)


# --------------------- one-time weight packing (host side) -----------------

def _conv_toeplitz(w, c_in, c_out, w_pool, in_lane):
    """Block-Toeplitz matrices T[parity*5+kh] (LANES, LANES) such that
    (X[kh:kh+H_out, :] @ T)[i, m*c_out+co] = conv(x)[co, i, 2m+parity] (no bias),
    where X rows are image rows and input lanes are given by in_lane(col, ci)."""
    k = w.shape[-1]
    t = np.zeros((2 * k, LANES, LANES), np.float32)
    for parity in range(2):
        for kh in range(k):
            blk = t[parity * k + kh]
            for kw in range(k):
                for ci in range(c_in):
                    for co in range(c_out):
                        for m in range(w_pool):
                            blk[in_lane(2 * m + parity + kw, ci),
                                m * c_out + co] = w[co, ci, kh, kw]
    return t


def _lane_bias(b, c_out, w_pool):
    v = np.zeros(LANES, np.float32)
    for m in range(w_pool):
        for co in range(c_out):
            v[m * c_out + co] = b[co]
    return v


def pack_params(params):
    """One-time re-layout of PyTorch-format weights into a single lane-dense
    (28, 128, 128) blob (Toeplitz convs, pre-permuted fc, biases as rows).
    Call OUTSIDE the jitted forward."""
    w1 = np.asarray(params["conv1_w"], np.float32)   # (6, 3, 5, 5)
    b1 = np.asarray(params["conv1_b"], np.float32)
    w2 = np.asarray(params["conv2_w"], np.float32)   # (16, 6, 5, 5)
    b2 = np.asarray(params["conv2_b"], np.float32)
    f1w = np.asarray(params["fc1_w"], np.float32)    # (120, 400)
    f1b = np.asarray(params["fc1_b"], np.float32)
    f2w = np.asarray(params["fc2_w"], np.float32)    # (84, 120)
    f2b = np.asarray(params["fc2_b"], np.float32)
    f3w = np.asarray(params["fc3_w"], np.float32)    # (10, 84)
    f3b = np.asarray(params["fc3_b"], np.float32)

    blob = np.zeros((_NBLK, LANES, LANES), np.float32)
    # conv1: input lanes are channel-major (ci*32 + w), matching the in-kernel
    # NCHW repack; output lanes are (pooled_col*6 + co).
    blob[_T1:_T1 + 10] = _conv_toeplitz(w1, 3, 6, 14,
                                        lambda col, ci: ci * 32 + col)
    # conv2: input lanes are pool1's (col*6 + ci) layout; output (col*16 + co).
    blob[_T2:_T2 + 10] = _conv_toeplitz(w2, 6, 16, 5,
                                        lambda col, ci: col * 6 + ci)
    # fc1 split over the 5 pooled rows; columns permuted from torch's (c,h,w)
    # flatten order to the kernel's (w*16 + c) lane layout.
    for h in range(5):
        for w_ in range(5):
            for c in range(16):
                blob[_F1 + h, w_ * 16 + c, :120] = f1w[:, c * 25 + h * 5 + w_]
    blob[_F2, :120, :84] = f2w.T
    blob[_F3, :84, :10] = f3w.T
    # biases live in the rows of the last block
    blob[_BIAS, _B1] = _lane_bias(b1, 6, 14)
    blob[_BIAS, _B2] = _lane_bias(b2, 16, 5)
    blob[_BIAS, _BF1, :120] = f1b
    blob[_BIAS, _BF2, :84] = f2b
    blob[_BIAS, _BF3, :10] = f3b
    return jnp.asarray(blob)


# ------------------------------ forward (jitted) ---------------------------

def net_forward(x_nchw, blob):
    """Forward pass matching PyTorch Net.forward. x: (1, 3, 32, 32) f32 NCHW.
    The jitted graph is a single fused pallas_call (relayout + slice fused)."""
    return _fused_lenet(x_nchw, blob)


# ------------------------- pure-JAX reference check ------------------------

def ref_forward(x, p):
    def conv(x, w, b):
        y = jax.lax.conv_general_dilated(
            x, w, window_strides=(1, 1), padding="VALID",
            dimension_numbers=("NCHW", "OIHW", "NCHW"))
        return y + b[None, :, None, None]

    def pool(x):
        n, c, h, w = x.shape
        return x.reshape(n, c, h // 2, 2, w // 2, 2).max(axis=(3, 5))

    y = pool(jax.nn.relu(conv(x, p["conv1_w"], p["conv1_b"])))
    y = pool(jax.nn.relu(conv(y, p["conv2_w"], p["conv2_b"])))
    y = y.reshape(1, -1)
    y = jax.nn.relu(y @ p["fc1_w"].T + p["fc1_b"])
    y = jax.nn.relu(y @ p["fc2_w"].T + p["fc2_b"])
    return y @ p["fc3_w"].T + p["fc3_b"]


if __name__ == "__main__":
    key = jax.random.PRNGKey(0)
    ks = jax.random.split(key, 11)

    def init(k, shape, scale):
        return jax.random.normal(k, shape, jnp.float32) * scale

    params = {
        "conv1_w": init(ks[0], (6, 3, 5, 5), 0.10),
        "conv1_b": init(ks[1], (6,), 0.10),
        "conv2_w": init(ks[2], (16, 6, 5, 5), 0.08),
        "conv2_b": init(ks[3], (16,), 0.08),
        "fc1_w": init(ks[4], (120, 400), 0.05),
        "fc1_b": init(ks[5], (120,), 0.05),
        "fc2_w": init(ks[6], (84, 120), 0.09),
        "fc2_b": init(ks[7], (84,), 0.09),
        "fc3_w": init(ks[8], (10, 84), 0.10),
        "fc3_b": init(ks[9], (10,), 0.10),
    }

    # input already "unsqueezed": batch of 1, NCHW (batch=1 fixed by the module)
    x = jax.random.normal(ks[10], (1, 3, 32, 32), jnp.float32)

    blob = pack_params(params)            # one-time weight layout packing
    fwd = jax.jit(net_forward)

    out = jax.block_until_ready(fwd(x, blob))

    expected = ref_forward(x, params)
    assert out.shape == (1, 10)
    assert jnp.allclose(out, expected, atol=5e-4, rtol=5e-4), \
        float(jnp.max(jnp.abs(out - expected)))

    print("KERNEL_OK")
</pallas_src>

<mosaic_0001>
module attributes {stable_mosaic.version = 11 : i64} {
  func.func @_lenet_kernel(%arg0: i32, %arg1: memref<1x3x32x32xf32, #tpu.memory_space<vmem>>, %arg2: memref<28x128x128xf32, #tpu.memory_space<vmem>>, %arg3: memref<1x10xf32, #tpu.memory_space<vmem>>, %arg4: memref<32x128xf32, #tpu.memory_space<vmem>>, %arg5: memref<28x128xf32, #tpu.memory_space<vmem>>, %arg6: memref<14x128xf32, #tpu.memory_space<vmem>>, %arg7: memref<10x128xf32, #tpu.memory_space<vmem>>, %arg8: memref<5x128xf32, #tpu.memory_space<vmem>>) attributes {dimension_semantics = [#tpu.dimension_semantics<parallel>], iteration_bounds = array<i64: 1>, scalar_prefetch = 0 : i64, scratch_operands = 5 : i64, tpu.core_type = #tpu.core_type<tc>, window_params = [{transform_indices = @transform_0, window_bounds = array<i64: 1, 3, 32, 32>}, {pipeline_mode = #tpu.pipeline_mode<synchronous>, transform_indices = @transform_1, window_bounds = array<i64: 28, 128, 128>}, {transform_indices = @transform_2, window_bounds = array<i64: 1, 10>}]} {
    %cst = arith.constant 0.000000e+00 : f32
    %0 = vector.broadcast %cst : f32 to vector<32x128xf32>
    %c0 = arith.constant 0 : index
    %c0_0 = arith.constant 0 : index
    %1 = vector.load %arg4[%c0, %c0_0] : memref<32x128xf32, #tpu.memory_space<vmem>>, vector<32x128xf32>
    tpu.vector_store %arg4[%c0, %c0_0], %0 {strides = array<i32>} : memref<32x128xf32, #tpu.memory_space<vmem>>, vector<32x128xf32>,
    %c0_1 = arith.constant 0 : index
    %c0_2 = arith.constant 0 : index
    %c0_3 = arith.constant 0 : index
    %c0_4 = arith.constant 0 : index
    %2 = vector.load %arg1[%c0_1, %c0_2, %c0_3, %c0_4] : memref<1x3x32x32xf32, #tpu.memory_space<vmem>>, vector<1x1x32x32xf32>
    %3 = vector.shape_cast %2 : vector<1x1x32x32xf32> to vector<32x32xf32>
    %c0_5 = arith.constant 0 : index
    %c0_6 = arith.constant 0 : index
    %4 = vector.load %arg4[%c0_5, %c0_6] : memref<32x128xf32, #tpu.memory_space<vmem>>, vector<32x32xf32>
    tpu.vector_store %arg4[%c0_5, %c0_6], %3 {strides = array<i32>} : memref<32x128xf32, #tpu.memory_space<vmem>>, vector<32x32xf32>,
    %c0_7 = arith.constant 0 : index
    %c1 = arith.constant 1 : index
    %c0_8 = arith.constant 0 : index
    %c0_9 = arith.constant 0 : index
    %5 = vector.load %arg1[%c0_7, %c1, %c0_8, %c0_9] : memref<1x3x32x32xf32, #tpu.memory_space<vmem>>, vector<1x1x32x32xf32>
    %6 = vector.shape_cast %5 : vector<1x1x32x32xf32> to vector<32x32xf32>
    %c0_10 = arith.constant 0 : index
    %c32 = arith.constant 32 : index
    %7 = vector.load %arg4[%c0_10, %c32] : memref<32x128xf32, #tpu.memory_space<vmem>>, vector<32x32xf32>
    tpu.vector_store %arg4[%c0_10, %c32], %6 {strides = array<i32>} : memref<32x128xf32, #tpu.memory_space<vmem>>, vector<32x32xf32>,
    %c0_11 = arith.constant 0 : index
    %c2 = arith.constant 2 : index
    %c0_12 = arith.constant 0 : index
    %c0_13 = arith.constant 0 : index
    %8 = vector.load %arg1[%c0_11, %c2, %c0_12, %c0_13] : memref<1x3x32x32xf32, #tpu.memory_space<vmem>>, vector<1x1x32x32xf32>
    %9 = vector.shape_cast %8 : vector<1x1x32x32xf32> to vector<32x32xf32>
    %c0_14 = arith.constant 0 : index
    %c64 = arith.constant 64 : index
    %10 = vector.load %arg4[%c0_14, %c64] : memref<32x128xf32, #tpu.memory_space<vmem>>, vector<32x32xf32>
    tpu.vector_store %arg4[%c0_14, %c64], %9 {strides = array<i32>} : memref<32x128xf32, #tpu.memory_space<vmem>>, vector<32x32xf32>,
    %cst_15 = arith.constant 0.000000e+00 : f32
    %11 = vector.broadcast %cst_15 : f32 to vector<28x128xf32>
    %cst_16 = arith.constant 0.000000e+00 : f32
    %12 = vector.broadcast %cst_16 : f32 to vector<28x128xf32>
    %c0_17 = arith.constant 0 : index
    %c0_18 = arith.constant 0 : index
    %13 = vector.load %arg4[%c0_17, %c0_18] : memref<32x128xf32, #tpu.memory_space<vmem>>, vector<28x128xf32>
    %c0_19 = arith.constant 0 : index
    %c0_20 = arith.constant 0 : index
    %c0_21 = arith.constant 0 : index
    %14 = vector.load %arg2[%c0_19, %c0_20, %c0_21] : memref<28x128x128xf32, #tpu.memory_space<vmem>>, vector<1x128x128xf32>
    %15 = vector.shape_cast %14 : vector<1x128x128xf32> to vector<128x128xf32>
    %cst_22 = arith.constant dense<0.000000e+00> : vector<28x128xf32>
    %16 = tpu.matmul %13, %15, %cst_22 {dimension_numbers = #tpu.dot_dimension_numbers<[1], [0], [0], [1], [0, 0, 1, 1], [], []>} : vector<28x128xf32>, vector<128x128xf32>, vector<28x128xf32> -> vector<28x128xf32>
    %17 = arith.addf %11, %16 : vector<28x128xf32>
    %c5 = arith.constant 5 : index
    %c0_23 = arith.constant 0 : index
    %c0_24 = arith.constant 0 : index
    %18 = vector.load %arg2[%c5, %c0_23, %c0_24] : memref<28x128x128xf32, #tpu.memory_space<vmem>>, vector<1x128x128xf32>
    %19 = vector.shape_cast %18 : vector<1x128x128xf32> to vector<128x128xf32>
    %cst_25 = arith.constant dense<0.000000e+00> : vector<28x128xf32>
    %20 = tpu.matmul %13, %19, %cst_25 {dimension_numbers = #tpu.dot_dimension_numbers<[1], [0], [0], [1], [0, 0, 1, 1], [], []>} : vector<28x128xf32>, vector<128x128xf32>, vector<28x128xf32> -> vector<28x128xf32>
    %21 = arith.addf %12, %20 : vector<28x128xf32>
    %c1_26 = arith.constant 1 : index
    %c0_27 = arith.constant 0 : index
    %22 = vector.load %arg4[%c1_26, %c0_27] : memref<32x128xf32, #tpu.memory_space<vmem>>, vector<28x128xf32>
    %c1_28 = arith.constant 1 : index
    %c0_29 = arith.constant 0 : index
    %c0_30 = arith.constant 0 : index
    %23 = vector.load %arg2[%c1_28, %c0_29, %c0_30] : memref<28x128x128xf32, #tpu.memory_space<vmem>>, vector<1x128x128xf32>
    %24 = vector.shape_cast %23 : vector<1x128x128xf32> to vector<128x128xf32>
    %cst_31 = arith.constant dense<0.000000e+00> : vector<28x128xf32>
    %25 = tpu.matmul %22, %24, %cst_31 {dimension_numbers = #tpu.dot_dimension_numbers<[1], [0], [0], [1], [0, 0, 1, 1], [], []>} : vector<28x128xf32>, vector<128x128xf32>, vector<28x128xf32> -> vector<28x128xf32>
    %26 = arith.addf %17, %25 : vector<28x128xf32>
    %c6 = arith.constant 6 : index
    %c0_32 = arith.constant 0 : index
    %c0_33 = arith.constant 0 : index
    %27 = vector.load %arg2[%c6, %c0_32, %c0_33] : memref<28x128x128xf32, #tpu.memory_space<vmem>>, vector<1x128x128xf32>
    %28 = vector.shape_cast %27 : vector<1x128x128xf32> to vector<128x128xf32>
    %cst_34 = arith.constant dense<0.000000e+00> : vector<28x128xf32>
    %29 = tpu.matmul %22, %28, %cst_34 {dimension_numbers = #tpu.dot_dimension_numbers<[1], [0], [0], [1], [0, 0, 1, 1], [], []>} : vector<28x128xf32>, vector<128x128xf32>, vector<28x128xf32> -> vector<28x128xf32>
    %30 = arith.addf %21, %29 : vector<28x128xf32>
    %c2_35 = arith.constant 2 : index
    %c0_36 = arith.constant 0 : index
    %31 = vector.load %arg4[%c2_35, %c0_36] : memref<32x128xf32, #tpu.memory_space<vmem>>, vector<28x128xf32>
    %c2_37 = arith.constant 2 : index
    %c0_38 = arith.constant 0 : index
    %c0_39 = arith.constant 0 : index
    %32 = vector.load %arg2[%c2_37, %c0_38, %c0_39] : memref<28x128x128xf32, #tpu.memory_space<vmem>>, vector<1x128x128xf32>
    %33 = vector.shape_cast %32 : vector<1x128x128xf32> to vector<128x128xf32>
    %cst_40 = arith.constant dense<0.000000e+00> : vector<28x128xf32>
    %34 = tpu.matmul %31, %33, %cst_40 {dimension_numbers = #tpu.dot_dimension_numbers<[1], [0], [0], [1], [0, 0, 1, 1], [], []>} : vector<28x128xf32>, vector<128x128xf32>, vector<28x128xf32> -> vector<28x128xf32>
    %35 = arith.addf %26, %34 : vector<28x128xf32>
    %c7 = arith.constant 7 : index
    %c0_41 = arith.constant 0 : index
    %c0_42 = arith.constant 0 : index
    %36 = vector.load %arg2[%c7, %c0_41, %c0_42] : memref<28x128x128xf32, #tpu.memory_space<vmem>>, vector<1x128x128xf32>
    %37 = vector.shape_cast %36 : vector<1x128x128xf32> to vector<128x128xf32>
    %cst_43 = arith.constant dense<0.000000e+00> : vector<28x128xf32>
    %38 = tpu.matmul %31, %37, %cst_43 {dimension_numbers = #tpu.dot_dimension_numbers<[1], [0], [0], [1], [0, 0, 1, 1], [], []>} : vector<28x128xf32>, vector<128x128xf32>, vector<28x128xf32> -> vector<28x128xf32>
    %39 = arith.addf %30, %38 : vector<28x128xf32>
    %c3 = arith.constant 3 : index
    %c0_44 = arith.constant 0 : index
    %40 = vector.load %arg4[%c3, %c0_44] : memref<32x128xf32, #tpu.memory_space<vmem>>, vector<28x128xf32>
    %c3_45 = arith.constant 3 : index
    %c0_46 = arith.constant 0 : index
    %c0_47 = arith.constant 0 : index
    %41 = vector.load %arg2[%c3_45, %c0_46, %c0_47] : memref<28x128x128xf32, #tpu.memory_space<vmem>>, vector<1x128x128xf32>
    %42 = vector.shape_cast %41 : vector<1x128x128xf32> to vector<128x128xf32>
    %cst_48 = arith.constant dense<0.000000e+00> : vector<28x128xf32>
    %43 = tpu.matmul %40, %42, %cst_48 {dimension_numbers = #tpu.dot_dimension_numbers<[1], [0], [0], [1], [0, 0, 1, 1], [], []>} : vector<28x128xf32>, vector<128x128xf32>, vector<28x128xf32> -> vector<28x128xf32>
    %44 = arith.addf %35, %43 : vector<28x128xf32>
    %c8 = arith.constant 8 : index
    %c0_49 = arith.constant 0 : index
    %c0_50 = arith.constant 0 : index
    %45 = vector.load %arg2[%c8, %c0_49, %c0_50] : memref<28x128x128xf32, #tpu.memory_space<vmem>>, vector<1x128x128xf32>
    %46 = vector.shape_cast %45 : vector<1x128x128xf32> to vector<128x128xf32>
    %cst_51 = arith.constant dense<0.000000e+00> : vector<28x128xf32>
    %47 = tpu.matmul %40, %46, %cst_51 {dimension_numbers = #tpu.dot_dimension_numbers<[1], [0], [0], [1], [0, 0, 1, 1], [], []>} : vector<28x128xf32>, vector<128x128xf32>, vector<28x128xf32> -> vector<28x128xf32>
    %48 = arith.addf %39, %47 : vector<28x128xf32>
    %c4 = arith.constant 4 : index
    %c0_52 = arith.constant 0 : index
    %49 = vector.load %arg4[%c4, %c0_52] : memref<32x128xf32, #tpu.memory_space<vmem>>, vector<28x128xf32>
    %c4_53 = arith.constant 4 : index
    %c0_54 = arith.constant 0 : index
    %c0_55 = arith.constant 0 : index
    %50 = vector.load %arg2[%c4_53, %c0_54, %c0_55] : memref<28x128x128xf32, #tpu.memory_space<vmem>>, vector<1x128x128xf32>
    %51 = vector.shape_cast %50 : vector<1x128x128xf32> to vector<128x128xf32>
    %cst_56 = arith.constant dense<0.000000e+00> : vector<28x128xf32>
    %52 = tpu.matmul %49, %51, %cst_56 {dimension_numbers = #tpu.dot_dimension_numbers<[1], [0], [0], [1], [0, 0, 1, 1], [], []>} : vector<28x128xf32>, vector<128x128xf32>, vector<28x128xf32> -> vector<28x128xf32>
    %53 = arith.addf %44, %52 : vector<28x128xf32>
    %c9 = arith.constant 9 : index
    %c0_57 = arith.constant 0 : index
    %c0_58 = arith.constant 0 : index
    %54 = vector.load %arg2[%c9, %c0_57, %c0_58] : memref<28x128x128xf32, #tpu.memory_space<vmem>>, vector<1x128x128xf32>
    %55 = vector.shape_cast %54 : vector<1x128x128xf32> to vector<128x128xf32>
    %cst_59 = arith.constant dense<0.000000e+00> : vector<28x128xf32>
    %56 = tpu.matmul %49, %55, %cst_59 {dimension_numbers = #tpu.dot_dimension_numbers<[1], [0], [0], [1], [0, 0, 1, 1], [], []>} : vector<28x128xf32>, vector<128x128xf32>, vector<28x128xf32> -> vector<28x128xf32>
    %57 = arith.addf %48, %56 : vector<28x128xf32>
    %58 = arith.maximumf %53, %57 : vector<28x128xf32>
    %c0_60 = arith.constant 0 : index
    %c0_61 = arith.constant 0 : index
    %59 = vector.load %arg5[%c0_60, %c0_61] : memref<28x128xf32, #tpu.memory_space<vmem>>, vector<28x128xf32>
    tpu.vector_store %arg5[%c0_60, %c0_61], %58 {strides = array<i32>} : memref<28x128xf32, #tpu.memory_space<vmem>>, vector<28x128xf32>,
    %c27 = arith.constant 27 : index
    %c0_62 = arith.constant 0 : index
    %c0_63 = arith.constant 0 : index
    %60 = vector.load %arg2[%c27, %c0_62, %c0_63] : memref<28x128x128xf32, #tpu.memory_space<vmem>>, vector<1x1x128xf32>
    %61 = vector.shape_cast %60 : vector<1x1x128xf32> to vector<1x128xf32>
    %c0_64 = arith.constant 0 : index
    %c0_65 = arith.constant 0 : index
    %62 = tpu.strided_load %arg5[%c0_64, %c0_65] {strides = array<i32: 2, 1>} : memref<28x128xf32, #tpu.memory_space<vmem>>, vector<14x128xf32>
    %c1_66 = arith.constant 1 : index
    %c0_67 = arith.constant 0 : index
    %63 = tpu.strided_load %arg5[%c1_66, %c0_67] {strides = array<i32: 2, 1>} : memref<28x128xf32, #tpu.memory_space<vmem>>, vector<14x128xf32>
    %64 = arith.maximumf %62, %63 : vector<14x128xf32>
    %65 = vector.broadcast %61 : vector<1x128xf32> to vector<14x128xf32>
    %66 = arith.addf %64, %65 : vector<14x128xf32>
    %cst_68 = arith.constant 0.000000e+00 : f32
    %67 = vector.broadcast %cst_68 : f32 to vector<14x128xf32>
    %68 = arith.maximumf %66, %67 : vector<14x128xf32>
    %c0_69 = arith.constant 0 : index
    %c0_70 = arith.constant 0 : index
    %69 = vector.load %arg6[%c0_69, %c0_70] : memref<14x128xf32, #tpu.memory_space<vmem>>, vector<14x128xf32>
    tpu.vector_store %arg6[%c0_69, %c0_70], %68 {strides = array<i32>} : memref<14x128xf32, #tpu.memory_space<vmem>>, vector<14x128xf32>,
    %cst_71 = arith.constant 0.000000e+00 : f32
    %70 = vector.broadcast %cst_71 : f32 to vector<10x128xf32>
    %cst_72 = arith.constant 0.000000e+00 : f32
    %71 = vector.broadcast %cst_72 : f32 to vector<10x128xf32>
    %c0_73 = arith.constant 0 : index
    %c0_74 = arith.constant 0 : index
    %72 = vector.load %arg6[%c0_73, %c0_74] : memref<14x128xf32, #tpu.memory_space<vmem>>, vector<10x128xf32>
    %c10 = arith.constant 10 : index
    %c0_75 = arith.constant 0 : index
    %c0_76 = arith.constant 0 : index
    %73 = vector.load %arg2[%c10, %c0_75, %c0_76] : memref<28x128x128xf32, #tpu.memory_space<vmem>>, vector<1x128x128xf32>
    %74 = vector.shape_cast %73 : vector<1x128x128xf32> to vector<128x128xf32>
    %cst_77 = arith.constant dense<0.000000e+00> : vector<10x128xf32>
    %75 = tpu.matmul %72, %74, %cst_77 {dimension_numbers = #tpu.dot_dimension_numbers<[1], [0], [0], [1], [0, 0, 1, 1], [], []>} : vector<10x128xf32>, vector<128x128xf32>, vector<10x128xf32> -> vector<10x128xf32>
    %76 = arith.addf %70, %75 : vector<10x128xf32>
    %c15 = arith.constant 15 : index
    %c0_78 = arith.constant 0 : index
    %c0_79 = arith.constant 0 : index
    %77 = vector.load %arg2[%c15, %c0_78, %c0_79] : memref<28x128x128xf32, #tpu.memory_space<vmem>>, vector<1x128x128xf32>
    %78 = vector.shape_cast %77 : vector<1x128x128xf32> to vector<128x128xf32>
    %cst_80 = arith.constant dense<0.000000e+00> : vector<10x128xf32>
    %79 = tpu.matmul %72, %78, %cst_80 {dimension_numbers = #tpu.dot_dimension_numbers<[1], [0], [0], [1], [0, 0, 1, 1], [], []>} : vector<10x128xf32>, vector<128x128xf32>, vector<10x128xf32> -> vector<10x128xf32>
    %80 = arith.addf %71, %79 : vector<10x128xf32>
    %c1_81 = arith.constant 1 : index
    %c0_82 = arith.constant 0 : index
    %81 = vector.load %arg6[%c1_81, %c0_82] : memref<14x128xf32, #tpu.memory_space<vmem>>, vector<10x128xf32>
    %c11 = arith.constant 11 : index
    %c0_83 = arith.constant 0 : index
    %c0_84 = arith.constant 0 : index
    %82 = vector.load %arg2[%c11, %c0_83, %c0_84] : memref<28x128x128xf32, #tpu.memory_space<vmem>>, vector<1x128x128xf32>
    %83 = vector.shape_cast %82 : vector<1x128x128xf32> to vector<128x128xf32>
    %cst_85 = arith.constant dense<0.000000e+00> : vector<10x128xf32>
    %84 = tpu.matmul %81, %83, %cst_85 {dimension_numbers = #tpu.dot_dimension_numbers<[1], [0], [0], [1], [0, 0, 1, 1], [], []>} : vector<10x128xf32>, vector<128x128xf32>, vector<10x128xf32> -> vector<10x128xf32>
    %85 = arith.addf %76, %84 : vector<10x128xf32>
    %c16 = arith.constant 16 : index
    %c0_86 = arith.constant 0 : index
    %c0_87 = arith.constant 0 : index
    %86 = vector.load %arg2[%c16, %c0_86, %c0_87] : memref<28x128x128xf32, #tpu.memory_space<vmem>>, vector<1x128x128xf32>
    %87 = vector.shape_cast %86 : vector<1x128x128xf32> to vector<128x128xf32>
    %cst_88 = arith.constant dense<0.000000e+00> : vector<10x128xf32>
    %88 = tpu.matmul %81, %87, %cst_88 {dimension_numbers = #tpu.dot_dimension_numbers<[1], [0], [0], [1], [0, 0, 1, 1], [], []>} : vector<10x128xf32>, vector<128x128xf32>, vector<10x128xf32> -> vector<10x128xf32>
    %89 = arith.addf %80, %88 : vector<10x128xf32>
    %c2_89 = arith.constant 2 : index
    %c0_90 = arith.constant 0 : index
    %90 = vector.load %arg6[%c2_89, %c0_90] : memref<14x128xf32, #tpu.memory_space<vmem>>, vector<10x128xf32>
    %c12 = arith.constant 12 : index
    %c0_91 = arith.constant 0 : index
    %c0_92 = arith.constant 0 : index
    %91 = vector.load %arg2[%c12, %c0_91, %c0_92] : memref<28x128x128xf32, #tpu.memory_space<vmem>>, vector<1x128x128xf32>
    %92 = vector.shape_cast %91 : vector<1x128x128xf32> to vector<128x128xf32>
    %cst_93 = arith.constant dense<0.000000e+00> : vector<10x128xf32>
    %93 = tpu.matmul %90, %92, %cst_93 {dimension_numbers = #tpu.dot_dimension_numbers<[1], [0], [0], [1], [0, 0, 1, 1], [], []>} : vector<10x128xf32>, vector<128x128xf32>, vector<10x128xf32> -> vector<10x128xf32>
    %94 = arith.addf %85, %93 : vector<10x128xf32>
    %c17 = arith.constant 17 : index
    %c0_94 = arith.constant 0 : index
    %c0_95 = arith.constant 0 : index
    %95 = vector.load %arg2[%c17, %c0_94, %c0_95] : memref<28x128x128xf32, #tpu.memory_space<vmem>>, vector<1x128x128xf32>
    %96 = vector.shape_cast %95 : vector<1x128x128xf32> to vector<128x128xf32>
    %cst_96 = arith.constant dense<0.000000e+00> : vector<10x128xf32>
    %97 = tpu.matmul %90, %96, %cst_96 {dimension_numbers = #tpu.dot_dimension_numbers<[1], [0], [0], [1], [0, 0, 1, 1], [], []>} : vector<10x128xf32>, vector<128x128xf32>, vector<10x128xf32> -> vector<10x128xf32>
    %98 = arith.addf %89, %97 : vector<10x128xf32>
    %c3_97 = arith.constant 3 : index
    %c0_98 = arith.constant 0 : index
    %99 = vector.load %arg6[%c3_97, %c0_98] : memref<14x128xf32, #tpu.memory_space<vmem>>, vector<10x128xf32>
    %c13 = arith.constant 13 : index
    %c0_99 = arith.constant 0 : index
    %c0_100 = arith.constant 0 : index
    %100 = vector.load %arg2[%c13, %c0_99, %c0_100] : memref<28x128x128xf32, #tpu.memory_space<vmem>>, vector<1x128x128xf32>
    %101 = vector.shape_cast %100 : vector<1x128x128xf32> to vector<128x128xf32>
    %cst_101 = arith.constant dense<0.000000e+00> : vector<10x128xf32>
    %102 = tpu.matmul %99, %101, %cst_101 {dimension_numbers = #tpu.dot_dimension_numbers<[1], [0], [0], [1], [0, 0, 1, 1], [], []>} : vector<10x128xf32>, vector<128x128xf32>, vector<10x128xf32> -> vector<10x128xf32>
    %103 = arith.addf %94, %102 : vector<10x128xf32>
    %c18 = arith.constant 18 : index
    %c0_102 = arith.constant 0 : index
    %c0_103 = arith.constant 0 : index
    %104 = vector.load %arg2[%c18, %c0_102, %c0_103] : memref<28x128x128xf32, #tpu.memory_space<vmem>>, vector<1x128x128xf32>
    %105 = vector.shape_cast %104 : vector<1x128x128xf32> to vector<128x128xf32>
    %cst_104 = arith.constant dense<0.000000e+00> : vector<10x128xf32>
    %106 = tpu.matmul %99, %105, %cst_104 {dimension_numbers = #tpu.dot_dimension_numbers<[1], [0], [0], [1], [0, 0, 1, 1], [], []>} : vector<10x128xf32>, vector<128x128xf32>, vector<10x128xf32> -> vector<10x128xf32>
    %107 = arith.addf %98, %106 : vector<10x128xf32>
    %c4_105 = arith.constant 4 : index
    %c0_106 = arith.constant 0 : index
    %108 = vector.load %arg6[%c4_105, %c0_106] : memref<14x128xf32, #tpu.memory_space<vmem>>, vector<10x128xf32>
    %c14 = arith.constant 14 : index
    %c0_107 = arith.constant 0 : index
    %c0_108 = arith.constant 0 : index
    %109 = vector.load %arg2[%c14, %c0_107, %c0_108] : memref<28x128x128xf32, #tpu.memory_space<vmem>>, vector<1x128x128xf32>
    %110 = vector.shape_cast %109 : vector<1x128x128xf32> to vector<128x128xf32>
    %cst_109 = arith.constant dense<0.000000e+00> : vector<10x128xf32>
    %111 = tpu.matmul %108, %110, %cst_109 {dimension_numbers = #tpu.dot_dimension_numbers<[1], [0], [0], [1], [0, 0, 1, 1], [], []>} : vector<10x128xf32>, vector<128x128xf32>, vector<10x128xf32> -> vector<10x128xf32>
    %112 = arith.addf %103, %111 : vector<10x128xf32>
    %c19 = arith.constant 19 : index
    %c0_110 = arith.constant 0 : index
    %c0_111 = arith.constant 0 : index
    %113 = vector.load %arg2[%c19, %c0_110, %c0_111] : memref<28x128x128xf32, #tpu.memory_space<vmem>>, vector<1x128x128xf32>
    %114 = vector.shape_cast %113 : vector<1x128x128xf32> to vector<128x128xf32>
    %cst_112 = arith.constant dense<0.000000e+00> : vector<10x128xf32>
    %115 = tpu.matmul %108, %114, %cst_112 {dimension_numbers = #tpu.dot_dimension_numbers<[1], [0], [0], [1], [0, 0, 1, 1], [], []>} : vector<10x128xf32>, vector<128x128xf32>, vector<10x128xf32> -> vector<10x128xf32>
    %116 = arith.addf %107, %115 : vector<10x128xf32>
    %117 = arith.maximumf %112, %116 : vector<10x128xf32>
    %c0_113 = arith.constant 0 : index
    %c0_114 = arith.constant 0 : index
    %118 = vector.load %arg7[%c0_113, %c0_114] : memref<10x128xf32, #tpu.memory_space<vmem>>, vector<10x128xf32>
    tpu.vector_store %arg7[%c0_113, %c0_114], %117 {strides = array<i32>} : memref<10x128xf32, #tpu.memory_space<vmem>>, vector<10x128xf32>,
    %c27_115 = arith.constant 27 : index
    %c1_116 = arith.constant 1 : index
    %c0_117 = arith.constant 0 : index
    %119 = vector.load %arg2[%c27_115, %c1_116, %c0_117] : memref<28x128x128xf32, #tpu.memory_space<vmem>>, vector<1x1x128xf32>
    %120 = vector.shape_cast %119 : vector<1x1x128xf32> to vector<1x128xf32>
    %c0_118 = arith.constant 0 : index
    %c0_119 = arith.constant 0 : index
    %121 = tpu.strided_load %arg7[%c0_118, %c0_119] {strides = array<i32: 2, 1>} : memref<10x128xf32, #tpu.memory_space<vmem>>, vector<5x128xf32>
    %c1_120 = arith.constant 1 : index
    %c0_121 = arith.constant 0 : index
    %122 = tpu.strided_load %arg7[%c1_120, %c0_121] {strides = array<i32: 2, 1>} : memref<10x128xf32, #tpu.memory_space<vmem>>, vector<5x128xf32>
    %123 = arith.maximumf %121, %122 : vector<5x128xf32>
    %124 = vector.broadcast %120 : vector<1x128xf32> to vector<5x128xf32>
    %125 = arith.addf %123, %124 : vector<5x128xf32>
    %cst_122 = arith.constant 0.000000e+00 : f32
    %126 = vector.broadcast %cst_122 : f32 to vector<5x128xf32>
    %127 = arith.maximumf %125, %126 : vector<5x128xf32>
    %c0_123 = arith.constant 0 : index
    %c0_124 = arith.constant 0 : index
    %128 = vector.load %arg8[%c0_123, %c0_124] : memref<5x128xf32, #tpu.memory_space<vmem>>, vector<5x128xf32>
    tpu.vector_store %arg8[%c0_123, %c0_124], %127 {strides = array<i32>} : memref<5x128xf32, #tpu.memory_space<vmem>>, vector<5x128xf32>,
    %cst_125 = arith.constant 0.000000e+00 : f32
    %129 = vector.broadcast %cst_125 : f32 to vector<1x128xf32>
    %c0_126 = arith.constant 0 : index
    %c0_127 = arith.constant 0 : index
    %130 = vector.load %arg8[%c0_126, %c0_127] : memref<5x128xf32, #tpu.memory_space<vmem>>, vector<1x128xf32>
    %c20 = arith.constant 20 : index
    %c0_128 = arith.constant 0 : index
    %c0_129 = arith.constant 0 : index
    %131 = vector.load %arg2[%c20, %c0_128, %c0_129] : memref<28x128x128xf32, #tpu.memory_space<vmem>>, vector<1x128x128xf32>
    %132 = vector.shape_cast %131 : vector<1x128x128xf32> to vector<128x128xf32>
    %cst_130 = arith.constant dense<0.000000e+00> : vector<1x128xf32>
    %133 = tpu.matmul %130, %132, %cst_130 {dimension_numbers = #tpu.dot_dimension_numbers<[1], [0], [0], [1], [0, 0, 1, 1], [], []>} : vector<1x128xf32>, vector<128x128xf32>, vector<1x128xf32> -> vector<1x128xf32>
    %134 = arith.addf %129, %133 : vector<1x128xf32>
    %c1_131 = arith.constant 1 : index
    %c0_132 = arith.constant 0 : index
    %135 = vector.load %arg8[%c1_131, %c0_132] : memref<5x128xf32, #tpu.memory_space<vmem>>, vector<1x128xf32>
    %c21 = arith.constant 21 : index
    %c0_133 = arith.constant 0 : index
    %c0_134 = arith.constant 0 : index
    %136 = vector.load %arg2[%c21, %c0_133, %c0_134] : memref<28x128x128xf32, #tpu.memory_space<vmem>>, vector<1x128x128xf32>
    %137 = vector.shape_cast %136 : vector<1x128x128xf32> to vector<128x128xf32>
    %cst_135 = arith.constant dense<0.000000e+00> : vector<1x128xf32>
    %138 = tpu.matmul %135, %137, %cst_135 {dimension_numbers = #tpu.dot_dimension_numbers<[1], [0], [0], [1], [0, 0, 1, 1], [], []>} : vector<1x128xf32>, vector<128x128xf32>, vector<1x128xf32> -> vector<1x128xf32>
    %139 = arith.addf %134, %138 : vector<1x128xf32>
    %c2_136 = arith.constant 2 : index
    %c0_137 = arith.constant 0 : index
    %140 = vector.load %arg8[%c2_136, %c0_137] : memref<5x128xf32, #tpu.memory_space<vmem>>, vector<1x128xf32>
    %c22 = arith.constant 22 : index
    %c0_138 = arith.constant 0 : index
    %c0_139 = arith.constant 0 : index
    %141 = vector.load %arg2[%c22, %c0_138, %c0_139] : memref<28x128x128xf32, #tpu.memory_space<vmem>>, vector<1x128x128xf32>
    %142 = vector.shape_cast %141 : vector<1x128x128xf32> to vector<128x128xf32>
    %cst_140 = arith.constant dense<0.000000e+00> : vector<1x128xf32>
    %143 = tpu.matmul %140, %142, %cst_140 {dimension_numbers = #tpu.dot_dimension_numbers<[1], [0], [0], [1], [0, 0, 1, 1], [], []>} : vector<1x128xf32>, vector<128x128xf32>, vector<1x128xf32> -> vector<1x128xf32>
    %144 = arith.addf %139, %143 : vector<1x128xf32>
    %c3_141 = arith.constant 3 : index
    %c0_142 = arith.constant 0 : index
    %145 = vector.load %arg8[%c3_141, %c0_142] : memref<5x128xf32, #tpu.memory_space<vmem>>, vector<1x128xf32>
    %c23 = arith.constant 23 : index
    %c0_143 = arith.constant 0 : index
    %c0_144 = arith.constant 0 : index
    %146 = vector.load %arg2[%c23, %c0_143, %c0_144] : memref<28x128x128xf32, #tpu.memory_space<vmem>>, vector<1x128x128xf32>
    %147 = vector.shape_cast %146 : vector<1x128x128xf32> to vector<128x128xf32>
    %cst_145 = arith.constant dense<0.000000e+00> : vector<1x128xf32>
    %148 = tpu.matmul %145, %147, %cst_145 {dimension_numbers = #tpu.dot_dimension_numbers<[1], [0], [0], [1], [0, 0, 1, 1], [], []>} : vector<1x128xf32>, vector<128x128xf32>, vector<1x128xf32> -> vector<1x128xf32>
    %149 = arith.addf %144, %148 : vector<1x128xf32>
    %c4_146 = arith.constant 4 : index
    %c0_147 = arith.constant 0 : index
    %150 = vector.load %arg8[%c4_146, %c0_147] : memref<5x128xf32, #tpu.memory_space<vmem>>, vector<1x128xf32>
    %c24 = arith.constant 24 : index
    %c0_148 = arith.constant 0 : index
    %c0_149 = arith.constant 0 : index
    %151 = vector.load %arg2[%c24, %c0_148, %c0_149] : memref<28x128x128xf32, #tpu.memory_space<vmem>>, vector<1x128x128xf32>
    %152 = vector.shape_cast %151 : vector<1x128x128xf32> to vector<128x128xf32>
    %cst_150 = arith.constant dense<0.000000e+00> : vector<1x128xf32>
    %153 = tpu.matmul %150, %152, %cst_150 {dimension_numbers = #tpu.dot_dimension_numbers<[1], [0], [0], [1], [0, 0, 1, 1], [], []>} : vector<1x128xf32>, vector<128x128xf32>, vector<1x128xf32> -> vector<1x128xf32>
    %154 = arith.addf %149, %153 : vector<1x128xf32>
    %c27_151 = arith.constant 27 : index
    %c2_152 = arith.constant 2 : index
    %c0_153 = arith.constant 0 : index
    %155 = vector.load %arg2[%c27_151, %c2_152, %c0_153] : memref<28x128x128xf32, #tpu.memory_space<vmem>>, vector<1x1x128xf32>
    %156 = vector.shape_cast %155 : vector<1x1x128xf32> to vector<1x128xf32>
    %157 = arith.addf %154, %156 : vector<1x128xf32>
    %cst_154 = arith.constant 0.000000e+00 : f32
    %158 = vector.broadcast %cst_154 : f32 to vector<1x128xf32>
    %159 = arith.maximumf %157, %158 : vector<1x128xf32>
    %c25 = arith.constant 25 : index
    %c0_155 = arith.constant 0 : index
    %c0_156 = arith.constant 0 : index
    %160 = vector.load %arg2[%c25, %c0_155, %c0_156] : memref<28x128x128xf32, #tpu.memory_space<vmem>>, vector<1x128x128xf32>
    %161 = vector.shape_cast %160 : vector<1x128x128xf32> to vector<128x128xf32>
    %cst_157 = arith.constant dense<0.000000e+00> : vector<1x128xf32>
    %162 = tpu.matmul %159, %161, %cst_157 {dimension_numbers = #tpu.dot_dimension_numbers<[1], [0], [0], [1], [0, 0, 1, 1], [], []>} : vector<1x128xf32>, vector<128x128xf32>, vector<1x128xf32> -> vector<1x128xf32>
    %c27_158 = arith.constant 27 : index
    %c3_159 = arith.constant 3 : index
    %c0_160 = arith.constant 0 : index
    %163 = vector.load %arg2[%c27_158, %c3_159, %c0_160] : memref<28x128x128xf32, #tpu.memory_space<vmem>>, vector<1x1x128xf32>
    %164 = vector.shape_cast %163 : vector<1x1x128xf32> to vector<1x128xf32>
    %165 = arith.addf %162, %164 : vector<1x128xf32>
    %cst_161 = arith.constant 0.000000e+00 : f32
    %166 = vector.broadcast %cst_161 : f32 to vector<1x128xf32>
    %167 = arith.maximumf %165, %166 : vector<1x128xf32>
    %c26 = arith.constant 26 : index
    %c0_162 = arith.constant 0 : index
    %c0_163 = arith.constant 0 : index
    %168 = vector.load %arg2[%c26, %c0_162, %c0_163] : memref<28x128x128xf32, #tpu.memory_space<vmem>>, vector<1x128x128xf32>
    %169 = vector.shape_cast %168 : vector<1x128x128xf32> to vector<128x128xf32>
    %cst_164 = arith.constant dense<0.000000e+00> : vector<1x128xf32>
    %170 = tpu.matmul %167, %169, %cst_164 {dimension_numbers = #tpu.dot_dimension_numbers<[1], [0], [0], [1], [0, 0, 1, 1], [], []>} : vector<1x128xf32>, vector<128x128xf32>, vector<1x128xf32> -> vector<1x128xf32>
    %c27_165 = arith.constant 27 : index
    %c4_166 = arith.constant 4 : index
    %c0_167 = arith.constant 0 : index
    %171 = vector.load %arg2[%c27_165, %c4_166, %c0_167] : memref<28x128x128xf32, #tpu.memory_space<vmem>>, vector<1x1x128xf32>
    %172 = vector.shape_cast %171 : vector<1x1x128xf32> to vector<1x128xf32>
    %173 = arith.addf %170, %172 : vector<1x128xf32>
    %174 = vector.extract_strided_slice %173 {offsets = [0, 0], sizes = [1, 10], strides = [1, 1]} : vector<1x128xf32> to vector<1x10xf32>
    %c0_168 = arith.constant 0 : index
    %c0_169 = arith.constant 0 : index
    %175 = vector.load %arg3[%c0_168, %c0_169] : memref<1x10xf32, #tpu.memory_space<vmem>>, vector<1x10xf32>
    tpu.vector_store %arg3[%c0_168, %c0_169], %174 {strides = array<i32>} : memref<1x10xf32, #tpu.memory_space<vmem>>, vector<1x10xf32>,
    return
  }
  func.func @transform_0(%arg0: i32) -> (i32, i32, i32, i32) {
    %c0_i32 = arith.constant 0 : i32
    %c0_i32_0 = arith.constant 0 : i32
    %c0_i32_1 = arith.constant 0 : i32
    %c0_i32_2 = arith.constant 0 : i32
    return %arg0, %c0_i32, %c0_i32_0, %c0_i32_1 : i32, i32, i32, i32
  }
  func.func @transform_1(%arg0: i32) -> (i32, i32, i32) {
    %c0_i32 = arith.constant 0 : i32
    %c0_i32_0 = arith.constant 0 : i32
    %c0_i32_1 = arith.constant 0 : i32
    %c0_i32_2 = arith.constant 0 : i32
    return %c0_i32, %c0_i32_0, %c0_i32_1 : i32, i32, i32
  }
  func.func @transform_2(%arg0: i32) -> (i32, i32) {
    %c0_i32 = arith.constant 0 : i32
    %c0_i32_0 = arith.constant 0 : i32
    return %arg0, %c0_i32 : i32, i32
  }
}

</mosaic_0001>

<bundles_post_ra>
// kernel: net_forward.1
= control target key start
LH: loop header
LB: loop body
LE: loop exit
PB: predicated region body
PF: predicated region fallthrough
CT: control target
= control target key end

     0   :  { %7 = vsyncpa [#allocation8], 0  ;;  %s5365_s0 = inlined_call_operand.hbm [shape: f32[1,3,32,32], index: 0, kind: input, shape index: {}]   ;;  %s5366_s1 = inlined_call_operand.hbm [shape: f32[28,128,128], index: 1, kind: input, shape index: {}]   ;;  %s5367_s2 = inlined_call_operand.hbm [shape: f32[1,10], index: 2, kind: output, shape index: {}]  }
   0x1   :  { %8 = vsyncpa [#allocation11], 0 }
   0x2   :  { %9 = vsyncpa [#allocation9], 0  ;;  %s5210_s9 = smov [#allocation7]   ;;  %s5138_s13 = scalar_lea.hbm %s5365_s0, 1536 }
   0x3   :  { %s15_s10 = sshll.u32 %s5210_s9, 4  ;;  %p5139_p0 = scmp.ne.s32.totalorder %s5365_s0, %s5138_s13  ;;  %s16_s10 = int_to_ptr.vmem [resolvable:$true] %s15_s10 }
   0x4   :  { %p5142_p1 = scmp.lt.u32.totalorder %s5138_s13, %s5365_s0 }
   0x6   :  { %p5144_p2 = pnand %p5142_p1, %p5139_p0 }
   0x8   :  { %5147 = shalt.err (!%p5144_p2)
}
   0x9   :  { %s5148_s18 = scalar_lea.vmem %s16_s10, 1536  ;;  %p5153_p4 = scmp.lt.s32.totalorder %s16_s10, %s16_s10 }
   0xa   :  { %p5149_p3 = scmp.ne.s32.totalorder %s16_s10, %s5148_s18  ;;  %p5154_p5 = scmp.lt.s32.totalorder %s5148_s18, %s5148_s18 }
   0xc   :  { %p5155_p6 = por %p5154_p5, %p5153_p4 }
   0xe   :  { %p5156_p7 = pnand %p5155_p6, %p5149_p3 }
  0x10   :  { %5159 = shalt.err (!%p5156_p7)
}
  0x11   :  { %s5211_s19 = smov 128   ;;  %s5212_s20 = smov 8  }
  0x12   :  { %21 = dma.hbm_to_vmem [thread:$0]  %s5365_s0, 1536, %s16_s10, [#allocation8], %s5211_s19, %s5211_s19, %s5212_s20  }
  0x13   :  { %s5213_s23 = smov [#allocation10]   ;;  %s5160_s27 = scalar_lea.hbm %s5366_s1, 57344 }
  0x14   :  { %s27_s24 = sshll.u32 %s5213_s23, 4  ;;  %p5161_p8 = scmp.ne.s32.totalorder %s5366_s1, %s5160_s27  ;;  %s28_s24 = int_to_ptr.vmem [resolvable:$true] %s27_s24 }
  0x15   :  { %p5164_p9 = scmp.lt.u32.totalorder %s5160_s27, %s5366_s1 }
  0x17   :  { %p5166_p10 = pnand %p5164_p9, %p5161_p8 }
  0x19   :  { %5169 = shalt.err (!%p5166_p10)
}
  0x1a   :  { %s5170_s4 = scalar_lea.vmem %s28_s24, 57344  ;;  %p5175_p12 = scmp.lt.s32.totalorder %s28_s24, %s28_s24 }
  0x1b   :  { %p5171_p11 = scmp.ne.s32.totalorder %s28_s24, %s5170_s4  ;;  %p5176_p13 = scmp.lt.s32.totalorder %s5170_s4, %s5170_s4 }
  0x1d   :  { %p5177_p0 = por %p5176_p13, %p5175_p12 }
  0x1f   :  { %p5178_p1 = pnand %p5177_p0, %p5171_p11 }
  0x21   :  { %5181 = shalt.err (!%p5178_p1)
}
  0x22   :  { %33 = dma.hbm_to_vmem [thread:$0]  %s5366_s1, 57344, %s28_s24, [#allocation11], %s5211_s19, %s5211_s19, %s5212_s20  }
  0x23   :  { %5204 = dma.done.wait [#allocation8], 1536  }
  0x24   :  { %5205 = vsyncadd [#allocation8], 4294965760 }
  0x25   :  { %5206 = dma.done.wait [#allocation11], 57344  }
  0x26   :  { %5207 = vsyncadd [#allocation11], 4294909952  ;;  %v5214_v0 = vmov 0.0   ;;  %v56_v1 = vld [vmem:[#allocation7 + $0x30] sm:$0xff]  ;;  %v54_v2 = vld [vmem:[#allocation7 + $0x20] sm:$0xff]  ;;  %s5215_s6 = smov 32  }
  0x27   :  { %42 = vst [vmem:[#allocation2 + $0x10] sm:$0xff] %v5214_v0  ;;  %40 = vst [vmem:[#allocation2] sm:$0xff] %v5214_v0  ;;  %66 = vrot.lane.b32.xlu1 %v56_v1, %s5215_s6  ;;  %62 = vrot.lane.b32.xlu0 %v54_v2, %s5215_s6  ;;  %v80_v3 = vld [vmem:[#allocation7 + $0x40] sm:$0xff]  ;;  %v55_v4 = vld [vmem:[#allocation7 + $0x28] sm:$0xff]  ;;  %s5216_s1 = smov 64   ;;  %vm48_vm0 = vcmask 261120  }
  0x28   :  { %41 = vst [vmem:[#allocation2 + $0x8] sm:$0xff] %v5214_v0  ;;  %43 = vst [vmem:[#allocation2 + $0x18] sm:$0xff] %v5214_v0  ;;  %v147_v5 = vld [vmem:[#allocation10 + $0x80] sm:$0xff]  ;;  %v148_v6 = vld [vmem:[#allocation10 + $0x88] sm:$0xff]  ;;  %vm74_vm1 = vcmask 523520   ;;  %vm100_vm2 = vcmask 785920  }
  0x29   :  { %v334_v7 = vld [vmem:[#allocation10 + $0x300] sm:$0xff]  ;;  %v335_v8 = vld [vmem:[#allocation10 + $0x308] sm:$0xff]  ;;  %v82_v9 = vld [vmem:[#allocation7 + $0x50] sm:$0xff]  ;;  %v4272_v10 = vpack.c.bf16 %v148_v6, %v147_v5  ;;  %vm5218_vm3 = vmmov 0   ;;  %s5219_s7 = smov [#allocation12]   ;;  %vm2778_vm4 = vcmask 73728  }
  0x2a   :  { %v4336_v11 = vpack.c.bf16 %v335_v8, %v334_v7  ;;  %v149_v12 = vld [vmem:[#allocation10 + $0x90] sm:$0xff]  ;;  %v150_v13 = vld [vmem:[#allocation10 + $0x98] sm:$0xff]  ;;  %v151_v17 = vld [vmem:[#allocation10 + $0xa0] sm:$0xff]  ;;  %s2786_s8 = sshll.u32 %s5219_s7, 4  ;;  %s2787_s8 = int_to_ptr.vmem [resolvable:$true] %s2786_s8 }
  0x2b   :  { %v336_v14 = vld [vmem:[#allocation10 + $0x310] sm:$0xff]  ;;  %88 = vrot.lane.b32.xlu1 %v80_v3, %s5216_s1  ;;  %64 = vrot.lane.b32.xlu0 %v55_v4, %s5215_s6  ;;  %v4276_v15 = vpack.c.bf16 %v150_v13, %v149_v12  ;;  %v337_v16 = vld [vmem:[#allocation10 + $0x318] sm:$0xff]  ;;  %v152_v18 = vld [vmem:[#allocation10 + $0xa8] sm:$0xff]  ;;  %s5182_s9 = scalar_lea.vmem %s2787_s8, 16  ;;  %s5186_s10 = scalar_lea.vmem %s2787_s8, 32 }
  0x2c   :  { %v81_v19 = vld [vmem:[#allocation7 + $0x48] sm:$0xff]  ;;  %4273 = vmatprep.subr.bf16.mxu0 %v4272_v10  ;;  %4337 = vmatprep.subr.bf16.mxu1 %v4336_v11  ;;  %v4340_v20 = vpack.c.bf16 %v337_v16, %v336_v14  ;;  %v338_v21 = vld [vmem:[#allocation10 + $0x320] sm:$0xff]  ;;  %v4280_v23 = vpack.c.bf16 %v152_v18, %v151_v17  ;;  %v153_v25 = vld [vmem:[#allocation10 + $0xb0] sm:$0xff]  ;;  %p5183_p2 = scmp.ne.s32.totalorder %s2787_s8, %s5182_s9  ;;  %p5187_p3 = scmp.lt.s32.totalorder %s2787_s8, %s2787_s8 }
  0x2d   :  { %v339_v22 = vld [vmem:[#allocation10 + $0x328] sm:$0xff]  ;;  %4275 = vmatpush3.bf16.msra.mxu0 %v4272_v10  ;;  %4339 = vmatpush3.bf16.msra.mxu1 %v4336_v11  ;;  %v46_v26 = vld [vmem:[#allocation7 + $0x10] sm:$0xff]  ;;  %v44_v27 = vld [vmem:[#allocation7] sm:$0xff]  ;;  %p5188_p4 = scmp.lt.s32.totalorder %s5186_s10, %s5182_s9 }
  0x2e   :  { %4277 = vmatprep.subr.bf16.mxu0 %v4276_v15  ;;  %4341 = vmatprep.subr.bf16.mxu1 %v4340_v20  ;;  %v4344_v24 = vpack.c.bf16 %v339_v22, %v338_v21  ;;  %v154_v28 = vld [vmem:[#allocation10 + $0xb8] sm:$0xff]  ;;  %v340_v29 = vld [vmem:[#allocation10 + $0x330] sm:$0xff]  ;;  %51 = vst.msk [vmem:[#allocation2 + $0x10] sm:$0xff] %vm48_vm0, %v46_v26  ;;  %49 = vst.msk [vmem:[#allocation2] sm:$0xff] %vm48_vm0, %v44_v27 }
  0x2f   :  { %92 = vrot.lane.b32.xlu1 %v82_v9, %s5216_s1  ;;  %90 = vrot.lane.b32.xlu0 %v81_v19, %s5216_s1  ;;  %v341_v30 = vld [vmem:[#allocation10 + $0x338] sm:$0xff]  ;;  %v45_v33 = vld [vmem:[#allocation7 + $0x8] sm:$0xff]  ;;  %v4284_v34 = vpack.c.bf16 %v154_v28, %v153_v25  ;;  %v155_v36 = vld [vmem:[#allocation10 + $0xc0] sm:$0xff]  ;;  %p5189_p5 = por %p5188_p4, %p5187_p3 }
  0x30   :  { %v57_v31 = vld [vmem:[#allocation7 + $0x38] sm:$0xff]  ;;  %50 = vst.msk [vmem:[#allocation2 + $0x8] sm:$0xff] %vm48_vm0, %v45_v33  ;;  %v4348_v35 = vpack.c.bf16 %v341_v30, %v340_v29  ;;  %v156_v37 = vld [vmem:[#allocation10 + $0xc8] sm:$0xff]  ;;  %v342_v38 = vld [vmem:[#allocation10 + $0x340] sm:$0xff] }
  0x31   :  { %v83_v32 = vld [vmem:[#allocation7 + $0x58] sm:$0xff]  ;;  %4279 = vmatpush3.bf16.msra.mxu0 %v4276_v15  ;;  %4343 = vmatpush3.bf16.msra.mxu1 %v4340_v20  ;;  %v343_v39 = vld [vmem:[#allocation10 + $0x348] sm:$0xff]  ;;  %v4288_v41 = vpack.c.bf16 %v156_v37, %v155_v36  ;;  %v157_v43 = vld [vmem:[#allocation10 + $0xd0] sm:$0xff]  ;;  %p5190_p6 = pnand %p5189_p5, %p5183_p2 }
  0x32   :  { %4281 = vmatprep.subr.bf16.mxu0 %v4280_v23  ;;  %4345 = vmatprep.subr.bf16.mxu1 %v4344_v24  ;;  %v47_v40 = vld [vmem:[#allocation7 + $0x18] sm:$0xff]  ;;  %v4352_v42 = vpack.c.bf16 %v343_v39, %v342_v38  ;;  %v344_v45 = vld [vmem:[#allocation10 + $0x350] sm:$0xff]  ;;  %v159_v49 = vld [vmem:[#allocation10 + $0xe0] sm:$0xff] }
  0x33   :  { %68 = vrot.lane.b32.xlu0 %v57_v31, %s5215_s6  ;;  %94 = vrot.lane.b32.xlu1 %v83_v32, %s5216_s1  ;;  %52 = vst.msk [vmem:[#allocation2 + $0x18] sm:$0xff] %vm48_vm0, %v47_v40  ;;  %v158_v44 = vld [vmem:[#allocation10 + $0xd8] sm:$0xff]  ;;  %v160_v50 = vld [vmem:[#allocation10 + $0xe8] sm:$0xff]  ;;  %v346_v51 = vld [vmem:[#allocation10 + $0x360] sm:$0xff] }
  0x34   :  { %v345_v46 = vld [vmem:[#allocation10 + $0x358] sm:$0xff]  ;;  %v4292_v47 = vpack.c.bf16 %v158_v44, %v157_v43  ;;  %v347_v52 = vld [vmem:[#allocation10 + $0x368] sm:$0xff]  ;;  %v4296_v53 = vpack.c.bf16 %v160_v50, %v159_v49  ;;  %v161_v55 = vld [vmem:[#allocation10 + $0xf0] sm:$0xff] }
  0x35   :  { %4283 = vmatpush3.bf16.msra.mxu0 %v4280_v23  ;;  %4347 = vmatpush3.bf16.msra.mxu1 %v4344_v24  ;;  %v4356_v48 = vpack.c.bf16 %v345_v46, %v344_v45  ;;  %v4360_v54 = vpack.c.bf16 %v347_v52, %v346_v51  ;;  %v162_v56 = vld [vmem:[#allocation10 + $0xf8] sm:$0xff]  ;;  %v348_v57 = vld [vmem:[#allocation10 + $0x370] sm:$0xff]  ;;  %v109_v61 = vld [vmem:[#allocation10] sm:$0xff] }
  0x36   :  { %4285 = vmatprep.subr.bf16.mxu0 %v4284_v34  ;;  %4349 = vmatprep.subr.bf16.mxu1 %v4348_v35  ;;  %v349_v58 = vld [vmem:[#allocation10 + $0x378] sm:$0xff]  ;;  %v4300_v59 = vpack.c.bf16 %v162_v56, %v161_v55  ;;  %v110_v62 = vld [vmem:[#allocation10 + $0x8] sm:$0xff]  ;;  %v126_v63 = vld [vmem:[#allocation10 + $0x280] sm:$0xff] }
  0x37   :  { %v4364_v60 = vpack.c.bf16 %v349_v58, %v348_v57  ;;  %v127_v1 = vld [vmem:[#allocation10 + $0x288] sm:$0xff]  ;;  %v4304_v2 = vpack.c.bf16 %v110_v62, %v109_v61  ;;  %v111_v12 = vld [vmem:[#allocation10 + $0x10] sm:$0xff]  ;;  %v112_v13 = vld [vmem:[#allocation10 + $0x18] sm:$0xff] }
  0x38   :  { %v4368_v3 = vpack.c.bf16 %v127_v1, %v126_v63  ;;  %v128_v14 = vld [vmem:[#allocation10 + $0x290] sm:$0xff]  ;;  %v129_v15 = vld [vmem:[#allocation10 + $0x298] sm:$0xff]  ;;  %v4308_v18 = vpack.c.bf16 %v112_v13, %v111_v12  ;;  %v113_v20 = vld [vmem:[#allocation10 + $0x20] sm:$0xff] }
  0x39   :  { %4287 = vmatpush3.bf16.msra.mxu0 %v4284_v34  ;;  %4351 = vmatpush3.bf16.msra.mxu1 %v4348_v35  ;;  %v4372_v19 = vpack.c.bf16 %v129_v15, %v128_v14  ;;  %v114_v21 = vld [vmem:[#allocation10 + $0x28] sm:$0xff]  ;;  %v130_v22 = vld [vmem:[#allocation10 + $0x2a0] sm:$0xff]  ;;  %v115_v24 = vld [vmem:[#allocation10 + $0x30] sm:$0xff] }
  0x3a   :  { %4289 = vmatprep.subr.bf16.mxu0 %v4288_v41  ;;  %4353 = vmatprep.subr.bf16.mxu1 %v4352_v42  ;;  %v131_v23 = vld [vmem:[#allocation10 + $0x2a8] sm:$0xff]  ;;  %v116_v25 = vld [vmem:[#allocation10 + $0x38] sm:$0xff]  ;;  %v132_v26 = vld [vmem:[#allocation10 + $0x2b0] sm:$0xff]  ;;  %v4312_v30 = vpack.c.bf16 %v114_v21, %v113_v20 }
  0x3b   :  { %v133_v29 = vld [vmem:[#allocation10 + $0x2b8] sm:$0xff]  ;;  %v4376_v31 = vpack.c.bf16 %v131_v23, %v130_v22  ;;  %v4316_v33 = vpack.c.bf16 %v116_v25, %v115_v24  ;;  %v117_v35 = vld [vmem:[#allocation10 + $0x40] sm:$0xff]  ;;  %v118_v36 = vld [vmem:[#allocation10 + $0x48] sm:$0xff] }
  0x3c   :  { %v4380_v34 = vpack.c.bf16 %v133_v29, %v132_v26  ;;  %v134_v37 = vld [vmem:[#allocation10 + $0x2c0] sm:$0xff]  ;;  %v135_v38 = vld [vmem:[#allocation10 + $0x2c8] sm:$0xff]  ;;  %v4320_v39 = vpack.c.bf16 %v118_v36, %v117_v35  ;;  %v136_v43 = vld [vmem:[#allocation10 + $0x2d0] sm:$0xff] }
  0x3d   :  { %4291 = vmatpush3.bf16.msra.mxu0 %v4288_v41  ;;  %4355 = vmatpush3.bf16.msra.mxu1 %v4352_v42  ;;  %v4384_v40 = vpack.c.bf16 %v135_v38, %v134_v37  ;;  %v119_v41 = vld [vmem:[#allocation10 + $0x50] sm:$0xff]  ;;  %v120_v42 = vld [vmem:[#allocation10 + $0x58] sm:$0xff]  ;;  %v138_v49 = vld [vmem:[#allocation10 + $0x2e0] sm:$0xff] }
  0x3e   :  { %4293 = vmatprep.subr.bf16.mxu0 %v4292_v47  ;;  %4357 = vmatprep.subr.bf16.mxu1 %v4356_v48  ;;  %v137_v44 = vld [vmem:[#allocation10 + $0x2d8] sm:$0xff]  ;;  %v4324_v45 = vpack.c.bf16 %v120_v42, %v119_v41  ;;  %v139_v50 = vld [vmem:[#allocation10 + $0x2e8] sm:$0xff]  ;;  %v140_v55 = vld [vmem:[#allocation10 + $0x2f0] sm:$0xff] }
  0x3f   :  { %v4388_v46 = vpack.c.bf16 %v137_v44, %v136_v43  ;;  %v4392_v52 = vpack.c.bf16 %v139_v50, %v138_v49  ;;  %v141_v56 = vld [vmem:[#allocation10 + $0x2f8] sm:$0xff]  ;;  %v631_v61 = vld [vmem:[#allocation10 + $0x380] sm:$0xff]  ;;  %v632_v62 = vld [vmem:[#allocation10 + $0x388] sm:$0xff] }
  0x40   :  { %v4396_v58 = vpack.c.bf16 %v141_v56, %v140_v55  ;;  %v4432_v1 = vpack.c.bf16 %v632_v62, %v631_v61  ;;  %v635_v12 = vld [vmem:[#allocation10 + $0x3a0] sm:$0xff]  ;;  %v636_v13 = vld [vmem:[#allocation10 + $0x3a8] sm:$0xff]  ;;  %v637_v20 = vld [vmem:[#allocation10 + $0x3b0] sm:$0xff] }
  0x41   :  { %4295 = vmatpush3.bf16.msra.mxu0 %v4292_v47  ;;  %4359 = vmatpush3.bf16.msra.mxu1 %v4356_v48  ;;  %v121_v47 = vld [vmem:[#allocation10 + $0x60] sm:$0xff]  ;;  %v122_v48 = vld [vmem:[#allocation10 + $0x68] sm:$0xff]  ;;  %v638_v21 = vld [vmem:[#allocation10 + $0x3b8] sm:$0xff] }
  0x42   :  { %4297 = vmatprep.subr.bf16.mxu0 %v4296_v53  ;;  %4361 = vmatprep.subr.bf16.mxu1 %v4360_v54  ;;  %v4328_v51 = vpack.c.bf16 %v122_v48, %v121_v47  ;;  %v4444_v23 = vpack.c.bf16 %v638_v21, %v637_v20  ;;  %v533_v24 = vld [vmem:[#allocation10 + $0x140] sm:$0xff]  ;;  %v534_v25 = vld [vmem:[#allocation10 + $0x148] sm:$0xff]  ;;  %v539_v42 = vld [vmem:[#allocation10 + $0x170] sm:$0xff] }
  0x43   :  { %v639_v26 = vld [vmem:[#allocation10 + $0x3c0] sm:$0xff]  ;;  %v538_v37 = vld [vmem:[#allocation10 + $0x168] sm:$0xff]  ;;  %v540_v43 = vld [vmem:[#allocation10 + $0x178] sm:$0xff] }
  0x44   :  { %v537_v36 = vld [vmem:[#allocation10 + $0x160] sm:$0xff]  ;;  %v645_v44 = vld [vmem:[#allocation10 + $0x3f0] sm:$0xff]  ;;  %v742_v49 = vld [vmem:[#allocation10 + $0x188] sm:$0xff] }
  0x45   :  { %4299 = vmatpush3.bf16.msra.mxu0 %v4296_v53  ;;  %4363 = vmatpush3.bf16.msra.mxu1 %v4360_v54  ;;  %v123_v53 = vld [vmem:[#allocation10 + $0x70] sm:$0xff]  ;;  %v124_v54 = vld [vmem:[#allocation10 + $0x78] sm:$0xff]  ;;  %v643_v38 = vld [vmem:[#allocation10 + $0x3e0] sm:$0xff] }
  0x46   :  { %4301 = vmatprep.subr.bf16.mxu0 %v4300_v59  ;;  %4365 = vmatprep.subr.bf16.mxu1 %v4364_v60  ;;  %v4332_v57 = vpack.c.bf16 %v124_v54, %v123_v53  ;;  %v741_v48 = vld [vmem:[#allocation10 + $0x180] sm:$0xff]  ;;  %v743_v54 = vld [vmem:[#allocation10 + $0x190] sm:$0xff]  ;;  %v744_v55 = vld [vmem:[#allocation10 + $0x198] sm:$0xff] }
  0x47   :  { %v847_v50 = vld [vmem:[#allocation10 + $0x400] sm:$0xff]  ;;  %v849_v56 = vld [vmem:[#allocation10 + $0x410] sm:$0xff]  ;;  %v746_v62 = vld [vmem:[#allocation10 + $0x1a8] sm:$0xff] }
  0x48   :  { %v745_v61 = vld [vmem:[#allocation10 + $0x1a0] sm:$0xff]  ;;  %v752_v20 = vld [vmem:[#allocation10 + $0x1d8] sm:$0xff]  ;;  %v857_v21 = vld [vmem:[#allocation10 + $0x450] sm:$0xff] }
  0x49   :  { %4303 = vmatpush3.bf16.msra.mxu0 %v4300_v59  ;;  %4367 = vmatpush3.bf16.msra.mxu1 %v4364_v60  ;;  %v525_v59 = vld [vmem:[#allocation10 + $0x100] sm:$0xff]  ;;  %v526_v60 = vld [vmem:[#allocation10 + $0x108] sm:$0xff] }
  0x4a   :  { %4305 = vmatprep.subr.bf16.mxu0 %v4304_v2  ;;  %4369 = vmatprep.subr.bf16.mxu1 %v4368_v3  ;;  %v4400_v63 = vpack.c.bf16 %v526_v60, %v525_v59  ;;  %v4468_v59 = vpack.c.bf16 %v744_v55, %v743_v54  ;;  %v1068_v54 = vld [vmem:[#allocation10 + $0x4a8] sm:$0xff] }
  0x99   :  { %v67_v4 = vpop.permute.xlu1 %66  ;;  %v63_v5 = vpop.permute.xlu0 %62 }
  0x9a   :  { %77 = vst.msk [vmem:[#allocation2 + $0x10] sm:$0xff] %vm74_vm1, %v67_v4  ;;  %75 = vst.msk [vmem:[#allocation2] sm:$0xff] %vm74_vm1, %v63_v5  ;;  %v633_v4 = vld [vmem:[#allocation10 + $0x390] sm:$0xff]  ;;  %v634_v5 = vld [vmem:[#allocation10 + $0x398] sm:$0xff] }
  0x9d   :  { %v89_v6 = vpop.permute.xlu1 %88  ;;  %v65_v7 = vpop.permute.xlu0 %64 }
  0x9e   :  { %101 = vst.msk [vmem:[#allocation2] sm:$0xff] %vm100_vm2, %v89_v6 }
  0x9f   :  { %76 = vst.msk [vmem:[#allocation2 + $0x8] sm:$0xff] %vm74_vm1, %v65_v7 }
  0xa1   :  { %v93_v8 = vpop.permute.xlu1 %92  ;;  %v91_v9 = vpop.permute.xlu0 %90 }
  0xa2   :  { %103 = vst.msk [vmem:[#allocation2 + $0x10] sm:$0xff] %vm100_vm2, %v93_v8  ;;  %102 = vst.msk [vmem:[#allocation2 + $0x8] sm:$0xff] %vm100_vm2, %v91_v9  ;;  %v4436_v8 = vpack.c.bf16 %v634_v5, %v633_v4  ;;  %v529_v9 = vld [vmem:[#allocation10 + $0x120] sm:$0xff]  ;;  %v4472_v4 = vpack.c.bf16 %v746_v62, %v745_v61  ;;  %v1069_v61 = vld [vmem:[#allocation10 + $0x4b0] sm:$0xff] }
  0xa3   :  { %v1070_v62 = vld [vmem:[#allocation10 + $0x4b8] sm:$0xff] }
  0xa5   :  { %v69_v10 = vpop.permute.xlu0 %68  ;;  %v95_v11 = vpop.permute.xlu1 %94  ;;  %v105_v32 = vld [vmem:[#allocation2] sm:$0xff] }
  0xa6   :  { %78 = vst.msk [vmem:[#allocation2 + $0x18] sm:$0xff] %vm74_vm1, %v69_v10  ;;  %v530_v10 = vld [vmem:[#allocation10 + $0x128] sm:$0xff] }
  0xa7   :  { %104 = vst.msk [vmem:[#allocation2 + $0x18] sm:$0xff] %vm100_vm2, %v95_v11  ;;  %v4408_v15 = vpack.c.bf16 %v530_v10, %v529_v9  ;;  %v853_v9 = vld [vmem:[#allocation10 + $0x430] sm:$0xff]  ;;  %v854_v10 = vld [vmem:[#allocation10 + $0x438] sm:$0xff] }
  0xa9   :  { %v142_v16 = vld [vmem:[#allocation2 + $0x1] sm:$0xff]  ;;  %v143_v17 = vld [vmem:[#allocation2 + $0x9] sm:$0xff] }
  0xaa   :  { %3329 = vmatprep.mubr.f32.mxu0 %v142_v16  ;;  %3405 = vmatprep.mubr.f32.mxu1 %v142_v16  ;;  %v106_v6 = vld [vmem:[#allocation2 + $0x8] sm:$0xff]  ;;  %v107_v11 = vld [vmem:[#allocation2 + $0x10] sm:$0xff]  ;;  %v4440_v16 = vpack.c.bf16 %v636_v13, %v635_v12  ;;  %v4508_v12 = vpack.c.bf16 %v854_v10, %v853_v9  ;;  %v968_v9 = vld [vmem:[#allocation10 + $0x258] sm:$0xff] }
  0xab   :  { %3330 = vmatmul.mubr.f32.vlgmr.msra.gmra.mrb[0].mxu0 %v143_v17  ;;  %3406 = vmatmul.mubr.f32.vlgmr.msra.gmra.mrb[0].mxu1 %v143_v17  ;;  %v531_v17 = vld [vmem:[#allocation10 + $0x130] sm:$0xff]  ;;  %v749_v13 = vld [vmem:[#allocation10 + $0x1c0] sm:$0xff] }
  0xac   :  { %4307 = vmatpush3.bf16.msra.mxu0 %v4304_v2  ;;  %4371 = vmatpush3.bf16.msra.mxu1 %v4368_v3  ;;  %v527_v2 = vld [vmem:[#allocation10 + $0x110] sm:$0xff]  ;;  %v528_v3 = vld [vmem:[#allocation10 + $0x118] sm:$0xff] }
  0xad   :  { %4309 = vmatprep.subr.bf16.mxu0 %v4308_v18  ;;  %4373 = vmatprep.subr.bf16.mxu1 %v4372_v19  ;;  %v4404_v7 = vpack.c.bf16 %v528_v3, %v527_v2  ;;  %v852_v2 = vld [vmem:[#allocation10 + $0x428] sm:$0xff]  ;;  %v1073_v10 = vld [vmem:[#allocation10 + $0x4d0] sm:$0xff] }
  0xae   :  { %v144_v27 = vld [vmem:[#allocation2 + $0x11] sm:$0xff]  ;;  %v145_v28 = vld [vmem:[#allocation2 + $0x19] sm:$0xf] }
  0xaf   :  { %3332 = vmatprep.mubr.f32.mxu0 %v144_v27  ;;  %3408 = vmatprep.mubr.f32.mxu1 %v144_v27  ;;  %v108_v14 = vld [vmem:[#allocation2 + $0x18] sm:$0xf]  ;;  %v640_v27 = vld [vmem:[#allocation10 + $0x3c8] sm:$0xff] }
  0xb0   :  { %4311 = vmatpush3.bf16.msra.mxu0 %v4308_v18  ;;  %4375 = vmatpush3.bf16.msra.mxu1 %v4372_v19  ;;  %v532_v18 = vld [vmem:[#allocation10 + $0x138] sm:$0xff]  ;;  %v4448_v29 = vpack.c.bf16 %v640_v27, %v639_v26  ;;  %v523_v3 = vld [vmem:[#allocation2 + $0x1a] sm:$0xf]  ;;  %v754_v26 = vld [vmem:[#allocation10 + $0x1e8] sm:$0xff] }
  0xb1   :  { %3333 = vmatmul.mubr.f32.gmra.mrb[2].mxu0 %v145_v28  ;;  %3409 = vmatmul.mubr.f32.gmra.mrb[2].mxu1 %v145_v28  ;;  %v520_v19 = vld [vmem:[#allocation2 + $0x2] sm:$0xff]  ;;  %v4412_v22 = vpack.c.bf16 %v532_v18, %v531_v17  ;;  %v4416_v28 = vpack.c.bf16 %v534_v25, %v533_v24  ;;  %v739_v55 = vld [vmem:[#allocation2 + $0x1b] sm:$0xf] }
  0xb2   :  { %3367 = vmatprep.mubr.f32.mxu0 %v105_v32  ;;  %3443 = vmatprep.mubr.f32.mxu1 %v105_v32  ;;  %v641_v32 = vld [vmem:[#allocation10 + $0x3d0] sm:$0xff]  ;;  %v753_v25 = vld [vmem:[#allocation10 + $0x1e0] sm:$0xff] }
  0xb3   :  { %4313 = vmatprep.subr.bf16.mxu0 %v4312_v30  ;;  %4377 = vmatprep.subr.bf16.mxu1 %v4376_v31  ;;  %v859_v27 = vld [vmem:[#allocation10 + $0x460] sm:$0xff] }
  0xb4   :  { %4315 = vmatpush3.bf16.msra.mxu0 %v4312_v30  ;;  %4379 = vmatpush3.bf16.msra.mxu1 %v4376_v31  ;;  %v535_v30 = vld [vmem:[#allocation10 + $0x150] sm:$0xff]  ;;  %v536_v31 = vld [vmem:[#allocation10 + $0x158] sm:$0xff] }
  0xb5   :  { %4317 = vmatprep.subr.bf16.mxu0 %v4316_v33  ;;  %4381 = vmatprep.subr.bf16.mxu1 %v4380_v34 }
  0xb8   :  { %4319 = vmatpush3.bf16.msra.mxu0 %v4316_v33  ;;  %4383 = vmatpush3.bf16.msra.mxu1 %v4380_v34  ;;  %v642_v33 = vld [vmem:[#allocation10 + $0x3d8] sm:$0xff]  ;;  %v4420_v34 = vpack.c.bf16 %v536_v31, %v535_v30  ;;  %v755_v31 = vld [vmem:[#allocation10 + $0x1f0] sm:$0xff] }
  0xb9   :  { %4321 = vmatprep.subr.bf16.mxu0 %v4320_v39  ;;  %4385 = vmatprep.subr.bf16.mxu1 %v4384_v40  ;;  %v4452_v35 = vpack.c.bf16 %v642_v33, %v641_v32  ;;  %v756_v32 = vld [vmem:[#allocation10 + $0x1f8] sm:$0xff]  ;;  %v861_v33 = vld [vmem:[#allocation10 + $0x470] sm:$0xff] }
  0xbc   :  { %4323 = vmatpush3.bf16.msra.mxu0 %v4320_v39  ;;  %4387 = vmatpush3.bf16.msra.mxu1 %v4384_v40  ;;  %v644_v39 = vld [vmem:[#allocation10 + $0x3e8] sm:$0xff]  ;;  %v4424_v40 = vpack.c.bf16 %v538_v37, %v537_v36  ;;  %v957_v37 = vld [vmem:[#allocation10 + $0x200] sm:$0xff] }
  0xbd   :  { %4325 = vmatprep.subr.bf16.mxu0 %v4324_v45  ;;  %4389 = vmatprep.subr.bf16.mxu1 %v4388_v46  ;;  %v4456_v41 = vpack.c.bf16 %v644_v39, %v643_v38  ;;  %v958_v38 = vld [vmem:[#allocation10 + $0x208] sm:$0xff]  ;;  %v1063_v39 = vld [vmem:[#allocation10 + $0x480] sm:$0xff] }
  0xc0   :  { %4327 = vmatpush3.bf16.msra.mxu0 %v4324_v45  ;;  %4391 = vmatpush3.bf16.msra.mxu1 %v4388_v46  ;;  %v646_v45 = vld [vmem:[#allocation10 + $0x3f8] sm:$0xff]  ;;  %v4428_v46 = vpack.c.bf16 %v540_v43, %v539_v42  ;;  %v959_v43 = vld [vmem:[#allocation10 + $0x210] sm:$0xff] }
  0xc1   :  { %4329 = vmatprep.subr.bf16.mxu0 %v4328_v51  ;;  %4393 = vmatprep.subr.bf16.mxu1 %v4392_v52  ;;  %v4460_v47 = vpack.c.bf16 %v646_v45, %v645_v44  ;;  %v960_v44 = vld [vmem:[#allocation10 + $0x218] sm:$0xff]  ;;  %v1065_v45 = vld [vmem:[#allocation10 + $0x490] sm:$0xff] }
  0xc4   :  { %4331 = vmatpush3.bf16.msra.mxu0 %v4328_v51  ;;  %4395 = vmatpush3.bf16.msra.mxu1 %v4392_v52  ;;  %v848_v51 = vld [vmem:[#allocation10 + $0x408] sm:$0xff]  ;;  %v4464_v52 = vpack.c.bf16 %v742_v49, %v741_v48  ;;  %v4532_v48 = vpack.c.bf16 %v960_v44, %v959_v43  ;;  %v1407_v43 = vld [vmem:[#allocation10 + $0x820] sm:$0xff] }
  0xc5   :  { %4333 = vmatprep.subr.bf16.mxu0 %v4332_v57  ;;  %4397 = vmatprep.subr.bf16.mxu1 %v4396_v58  ;;  %v4496_v53 = vpack.c.bf16 %v848_v51, %v847_v50  ;;  %v961_v50 = vld [vmem:[#allocation10 + $0x220] sm:$0xff]  ;;  %v962_v51 = vld [vmem:[#allocation10 + $0x228] sm:$0xff] }
  0xc8   :  { %4335 = vmatpush3.bf16.msra.mxu0 %v4332_v57  ;;  %4399 = vmatpush3.bf16.msra.mxu1 %v4396_v58  ;;  %v850_v57 = vld [vmem:[#allocation10 + $0x418] sm:$0xff]  ;;  %v521_v58 = vld [vmem:[#allocation2 + $0xa] sm:$0xff] }
  0xc9   :  { %4401 = vmatprep.subr.bf16.mxu0 %v4400_v63  ;;  %4433 = vmatprep.subr.bf16.mxu1 %v4432_v1  ;;  %v4500_v60 = vpack.c.bf16 %v850_v57, %v849_v56  ;;  %v4536_v56 = vpack.c.bf16 %v962_v51, %v961_v50  ;;  %v1410_v51 = vld [vmem:[#allocation10 + $0x838] sm:$0xff] }
  0xcb   :  { %3368 = vmatmul.mubr.f32.vlgmr.msra.gmra.mrb[0].mxu0 %v106_v6  ;;  %3444 = vmatmul.mubr.f32.vlgmr.msra.gmra.mrb[0].mxu1 %v106_v6  ;;  %v747_v6 = vld [vmem:[#allocation10 + $0x1b0] sm:$0xff] }
  0xcc   :  { %3370 = vmatprep.mubr.f32.mxu0 %v107_v11  ;;  %3446 = vmatprep.mubr.f32.mxu1 %v107_v11 }
  0xcd   :  { %4403 = vmatpush3.bf16.msra.mxu0 %v4400_v63  ;;  %4435 = vmatpush3.bf16.msra.mxu1 %v4432_v1  ;;  %v522_v63 = vld [vmem:[#allocation2 + $0x12] sm:$0xff]  ;;  %v851_v1 = vld [vmem:[#allocation10 + $0x420] sm:$0xff] }
  0xce   :  { %4405 = vmatprep.subr.bf16.mxu0 %v4404_v7  ;;  %4437 = vmatprep.subr.bf16.mxu1 %v4436_v8  ;;  %v4504_v5 = vpack.c.bf16 %v852_v2, %v851_v1  ;;  %v4572_v1 = vpack.c.bf16 %v1070_v62, %v1069_v61  ;;  %v965_v2 = vld [vmem:[#allocation10 + $0x240] sm:$0xff]  ;;  %v1413_v61 = vld [vmem:[#allocation10 + $0x850] sm:$0xff] }
  0xcf   :  { %3371 = vmatmul.mubr.f32.gmra.mrb[2].mxu0 %v108_v14  ;;  %3447 = vmatmul.mubr.f32.gmra.mrb[2].mxu1 %v108_v14  ;;  %v750_v14 = vld [vmem:[#allocation10 + $0x1c8] sm:$0xff] }
  0xd0   :  { %3481 = vmatprep.mubr.f32.mxu0 %v520_v19  ;;  %3519 = vmatprep.mubr.f32.mxu1 %v520_v19  ;;  %v4480_v17 = vpack.c.bf16 %v750_v14, %v749_v13  ;;  %v751_v19 = vld [vmem:[#allocation10 + $0x1d0] sm:$0xff]  ;;  %v969_v14 = vld [vmem:[#allocation10 + $0x260] sm:$0xff] }
  0xd1   :  { %4407 = vmatpush3.bf16.msra.mxu0 %v4404_v7  ;;  %4439 = vmatpush3.bf16.msra.mxu1 %v4436_v8  ;;  %v748_v7 = vld [vmem:[#allocation10 + $0x1b8] sm:$0xff] }
  0xd2   :  { %4409 = vmatprep.subr.bf16.mxu0 %v4408_v15  ;;  %4441 = vmatprep.subr.bf16.mxu1 %v4440_v16  ;;  %v736_v8 = vld [vmem:[#allocation2 + $0x3] sm:$0xff]  ;;  %v4476_v11 = vpack.c.bf16 %v748_v7, %v747_v6 }
  0xd5   :  { %4411 = vmatpush3.bf16.msra.mxu0 %v4408_v15  ;;  %4443 = vmatpush3.bf16.msra.mxu1 %v4440_v16  ;;  %v855_v15 = vld [vmem:[#allocation10 + $0x440] sm:$0xff]  ;;  %v856_v16 = vld [vmem:[#allocation10 + $0x448] sm:$0xff] }
  0xd6   :  { %4413 = vmatprep.subr.bf16.mxu0 %v4412_v22  ;;  %4445 = vmatprep.subr.bf16.mxu1 %v4444_v23  ;;  %v4512_v18 = vpack.c.bf16 %v856_v16, %v855_v15  ;;  %v970_v15 = vld [vmem:[#allocation10 + $0x268] sm:$0xff]  ;;  %v1075_v16 = vld [vmem:[#allocation10 + $0x4e0] sm:$0xff] }
  0xd9   :  { %4415 = vmatpush3.bf16.msra.mxu0 %v4412_v22  ;;  %4447 = vmatpush3.bf16.msra.mxu1 %v4444_v23  ;;  %v858_v22 = vld [vmem:[#allocation10 + $0x458] sm:$0xff]  ;;  %v4484_v23 = vpack.c.bf16 %v752_v20, %v751_v19  ;;  %v971_v20 = vld [vmem:[#allocation10 + $0x270] sm:$0xff] }
  0xda   :  { %4417 = vmatprep.subr.bf16.mxu0 %v4416_v28  ;;  %4449 = vmatprep.subr.bf16.mxu1 %v4448_v29  ;;  %v4516_v24 = vpack.c.bf16 %v858_v22, %v857_v21  ;;  %v972_v21 = vld [vmem:[#allocation10 + $0x278] sm:$0xff]  ;;  %v1077_v22 = vld [vmem:[#allocation10 + $0x4f0] sm:$0xff] }
  0xdd   :  { %4419 = vmatpush3.bf16.msra.mxu0 %v4416_v28  ;;  %4451 = vmatpush3.bf16.msra.mxu1 %v4448_v29  ;;  %v860_v28 = vld [vmem:[#allocation10 + $0x468] sm:$0xff]  ;;  %v4488_v29 = vpack.c.bf16 %v754_v26, %v753_v25  ;;  %v1236_v26 = vld [vmem:[#allocation10 + $0x580] sm:$0xff] }
  0xde   :  { %4421 = vmatprep.subr.bf16.mxu0 %v4420_v34  ;;  %4453 = vmatprep.subr.bf16.mxu1 %v4452_v35  ;;  %v4520_v30 = vpack.c.bf16 %v860_v28, %v859_v27  ;;  %v1237_v27 = vld [vmem:[#allocation10 + $0x588] sm:$0xff]  ;;  %v1403_v28 = vld [vmem:[#allocation10 + $0x800] sm:$0xff] }
  0xe1   :  { %4423 = vmatpush3.bf16.msra.mxu0 %v4420_v34  ;;  %4455 = vmatpush3.bf16.msra.mxu1 %v4452_v35  ;;  %v862_v34 = vld [vmem:[#allocation10 + $0x478] sm:$0xff]  ;;  %v4492_v35 = vpack.c.bf16 %v756_v32, %v755_v31  ;;  %v953_v32 = vld [vmem:[#allocation2 + $0xc] sm:$0xff] }
  0xe2   :  { %4425 = vmatprep.subr.bf16.mxu0 %v4424_v40  ;;  %4457 = vmatprep.subr.bf16.mxu1 %v4456_v41  ;;  %v4524_v36 = vpack.c.bf16 %v862_v34, %v861_v33  ;;  %v954_v33 = vld [vmem:[#allocation2 + $0x14] sm:$0xff]  ;;  %v955_v34 = vld [vmem:[#allocation2 + $0x1c] sm:$0xf] }
  0xe5   :  { %4427 = vmatpush3.bf16.msra.mxu0 %v4424_v40  ;;  %4459 = vmatpush3.bf16.msra.mxu1 %v4456_v41  ;;  %v1064_v40 = vld [vmem:[#allocation10 + $0x488] sm:$0xff]  ;;  %v4528_v41 = vpack.c.bf16 %v958_v38, %v957_v37  ;;  %v1405_v37 = vld [vmem:[#allocation10 + $0x810] sm:$0xff] }
  0xe6   :  { %4429 = vmatprep.subr.bf16.mxu0 %v4428_v46  ;;  %4461 = vmatprep.subr.bf16.mxu1 %v4460_v47  ;;  %v4560_v42 = vpack.c.bf16 %v1064_v40, %v1063_v39  ;;  %v1406_v39 = vld [vmem:[#allocation10 + $0x818] sm:$0xff] }
  0xe7   :  { %v4660_v40 = vpack.c.bf16 %v1406_v39, %v1405_v37 }
  0xe9   :  { %4431 = vmatpush3.bf16.msra.mxu0 %v4428_v46  ;;  %4463 = vmatpush3.bf16.msra.mxu1 %v4460_v47  ;;  %v1066_v46 = vld [vmem:[#allocation10 + $0x498] sm:$0xff]  ;;  %v737_v47 = vld [vmem:[#allocation2 + $0xb] sm:$0xff] }
  0xea   :  { %4465 = vmatprep.subr.bf16.mxu0 %v4464_v52  ;;  %4497 = vmatprep.subr.bf16.mxu1 %v4496_v53  ;;  %v4564_v49 = vpack.c.bf16 %v1066_v46, %v1065_v45  ;;  %v1408_v45 = vld [vmem:[#allocation10 + $0x828] sm:$0xff] }
  0xeb   :  { %v4664_v46 = vpack.c.bf16 %v1408_v45, %v1407_v43  ;;  %v1202_v43 = vld [vmem:[#allocation10 + $0x510] sm:$0xff] }
  0xec   :  { %3482 = vmatmul.mubr.f32.vlgmr.msra.gmra.mrb[0].mxu0 %v521_v58  ;;  %3520 = vmatmul.mubr.f32.vlgmr.msra.gmra.mrb[0].mxu1 %v521_v58  ;;  %v963_v58 = vld [vmem:[#allocation10 + $0x230] sm:$0xff] }
  0xed   :  { %3484 = vmatprep.mubr.f32.mxu0 %v522_v63  ;;  %3522 = vmatprep.mubr.f32.mxu1 %v522_v63  ;;  %v1219_v45 = vld [vmem:[#allocation10 + $0x790] sm:$0xff] }
  0xee   :  { %4467 = vmatpush3.bf16.msra.mxu0 %v4464_v52  ;;  %4499 = vmatpush3.bf16.msra.mxu1 %v4496_v53  ;;  %v738_v52 = vld [vmem:[#allocation2 + $0x13] sm:$0xff]  ;;  %v1067_v53 = vld [vmem:[#allocation10 + $0x4a0] sm:$0xff] }
  0xef   :  { %4469 = vmatprep.subr.bf16.mxu0 %v4468_v59  ;;  %4501 = vmatprep.subr.bf16.mxu1 %v4500_v60  ;;  %v4568_v57 = vpack.c.bf16 %v1068_v54, %v1067_v53  ;;  %v1244_v53 = vld [vmem:[#allocation10 + $0x5c0] sm:$0xff]  ;;  %v1245_v54 = vld [vmem:[#allocation10 + $0x5c8] sm:$0xff] }
  0xf0   :  { %3485 = vmatmul.mubr.f32.gmra.mrb[2].mxu0 %v523_v3  ;;  %3523 = vmatmul.mubr.f32.gmra.mrb[2].mxu1 %v523_v3  ;;  %v966_v3 = vld [vmem:[#allocation10 + $0x248] sm:$0xff] }
  0xf1   :  { %3557 = vmatprep.mubr.f32.mxu0 %v736_v8  ;;  %3595 = vmatprep.mubr.f32.mxu1 %v736_v8  ;;  %v4544_v6 = vpack.c.bf16 %v966_v3, %v965_v2  ;;  %v967_v8 = vld [vmem:[#allocation10 + $0x250] sm:$0xff]  ;;  %v1249_v2 = vld [vmem:[#allocation10 + $0x5e8] sm:$0xff] }
  0xf2   :  { %4471 = vmatpush3.bf16.msra.mxu0 %v4468_v59  ;;  %4503 = vmatpush3.bf16.msra.mxu1 %v4500_v60  ;;  %v964_v59 = vld [vmem:[#allocation10 + $0x238] sm:$0xff] }
  0xf3   :  { %4473 = vmatprep.subr.bf16.mxu0 %v4472_v4  ;;  %4505 = vmatprep.subr.bf16.mxu1 %v4504_v5  ;;  %v952_v60 = vld [vmem:[#allocation2 + $0x4] sm:$0xff]  ;;  %v4540_v63 = vpack.c.bf16 %v964_v59, %v963_v58  ;;  %v1246_v59 = vld [vmem:[#allocation10 + $0x5d0] sm:$0xff] }
  0xf6   :  { %4475 = vmatpush3.bf16.msra.mxu0 %v4472_v4  ;;  %4507 = vmatpush3.bf16.msra.mxu1 %v4504_v5  ;;  %v1071_v4 = vld [vmem:[#allocation10 + $0x4c0] sm:$0xff]  ;;  %v1072_v5 = vld [vmem:[#allocation10 + $0x4c8] sm:$0xff] }
  0xf7   :  { %4477 = vmatprep.subr.bf16.mxu0 %v4476_v11  ;;  %4509 = vmatprep.subr.bf16.mxu1 %v4508_v12  ;;  %v4576_v7 = vpack.c.bf16 %v1072_v5, %v1071_v4  ;;  %v1415_v5 = vld [vmem:[#allocation10 + $0x860] sm:$0xff] }
  0xfa   :  { %4479 = vmatpush3.bf16.msra.mxu0 %v4476_v11  ;;  %4511 = vmatpush3.bf16.msra.mxu1 %v4508_v12  ;;  %v1074_v11 = vld [vmem:[#allocation10 + $0x4d8] sm:$0xff]  ;;  %v4548_v12 = vpack.c.bf16 %v968_v9, %v967_v8 }
  0xfb   :  { %4481 = vmatprep.subr.bf16.mxu0 %v4480_v17  ;;  %4513 = vmatprep.subr.bf16.mxu1 %v4512_v18  ;;  %v4580_v13 = vpack.c.bf16 %v1074_v11, %v1073_v10  ;;  %v1251_v9 = vld [vmem:[#allocation10 + $0x5f8] sm:$0xff]  ;;  %v1417_v10 = vld [vmem:[#allocation10 + $0x870] sm:$0xff] }
  0xfc   :  { %v1418_v11 = vld [vmem:[#allocation10 + $0x878] sm:$0xff] }
  0xfe   :  { %4483 = vmatpush3.bf16.msra.mxu0 %v4480_v17  ;;  %4515 = vmatpush3.bf16.msra.mxu1 %v4512_v18  ;;  %v1076_v17 = vld [vmem:[#allocation10 + $0x4e8] sm:$0xff]  ;;  %v4552_v18 = vpack.c.bf16 %v970_v15, %v969_v14  ;;  %v1200_v14 = vld [vmem:[#allocation10 + $0x500] sm:$0xff] }
  0xff   :  { %4485 = vmatprep.subr.bf16.mxu0 %v4484_v23  ;;  %4517 = vmatprep.subr.bf16.mxu1 %v4516_v24  ;;  %v4584_v19 = vpack.c.bf16 %v1076_v17, %v1075_v16  ;;  %v1201_v15 = vld [vmem:[#allocation10 + $0x508] sm:$0xff]  ;;  %v1217_v16 = vld [vmem:[#allocation10 + $0x780] sm:$0xff] }
 0x100   :  { %v4624_v17 = vpack.c.bf16 %v1201_v15, %v1200_v14  ;;  %v1229_v14 = vld [vmem:[#allocation10 + $0x7e0] sm:$0xff]  ;;  %v1230_v15 = vld [vmem:[#allocation10 + $0x7e8] sm:$0xff] }
 0x102   :  { %4487 = vmatpush3.bf16.msra.mxu0 %v4484_v23  ;;  %4519 = vmatpush3.bf16.msra.mxu1 %v4516_v24  ;;  %v1078_v23 = vld [vmem:[#allocation10 + $0x4f8] sm:$0xff]  ;;  %v4556_v24 = vpack.c.bf16 %v972_v21, %v971_v20 }
 0x103   :  { %4489 = vmatprep.subr.bf16.mxu0 %v4488_v29  ;;  %4521 = vmatprep.subr.bf16.mxu1 %v4520_v30  ;;  %v4588_v25 = vpack.c.bf16 %v1078_v23, %v1077_v22 }
 0x106   :  { %4491 = vmatpush3.bf16.msra.mxu0 %v4488_v29  ;;  %4523 = vmatpush3.bf16.msra.mxu1 %v4520_v30  ;;  %v1404_v29 = vld [vmem:[#allocation10 + $0x808] sm:$0xff]  ;;  %v4592_v30 = vpack.c.bf16 %v1237_v27, %v1236_v26 }
 0x107   :  { %4493 = vmatprep.subr.bf16.mxu0 %v4492_v35  ;;  %4525 = vmatprep.subr.bf16.mxu1 %v4524_v36  ;;  %v4656_v31 = vpack.c.bf16 %v1404_v29, %v1403_v28 }
 0x10a   :  { %4495 = vmatpush3.bf16.msra.mxu0 %v4492_v35  ;;  %4527 = vmatpush3.bf16.msra.mxu1 %v4524_v36  ;;  %v1238_v35 = vld [vmem:[#allocation10 + $0x590] sm:$0xff]  ;;  %v1239_v36 = vld [vmem:[#allocation10 + $0x598] sm:$0xff] }
 0x10b   :  { %4529 = vmatprep.subr.bf16.mxu0 %v4528_v41  ;;  %4561 = vmatprep.subr.bf16.mxu1 %v4560_v42  ;;  %v4596_v38 = vpack.c.bf16 %v1239_v36, %v1238_v35 }
 0x10d   :  { %3558 = vmatmul.mubr.f32.vlgmr.msra.gmra.mrb[0].mxu0 %v737_v47  ;;  %3596 = vmatmul.mubr.f32.vlgmr.msra.gmra.mrb[0].mxu1 %v737_v47  ;;  %v1242_v47 = vld [vmem:[#allocation10 + $0x5b0] sm:$0xff] }
 0x10e   :  { %3560 = vmatprep.mubr.f32.mxu0 %v738_v52  ;;  %3598 = vmatprep.mubr.f32.mxu1 %v738_v52 }
 0x10f   :  { %4531 = vmatpush3.bf16.msra.mxu0 %v4528_v41  ;;  %4563 = vmatpush3.bf16.msra.mxu1 %v4560_v42  ;;  %v1240_v41 = vld [vmem:[#allocation10 + $0x5a0] sm:$0xff]  ;;  %v1241_v42 = vld [vmem:[#allocation10 + $0x5a8] sm:$0xff] }
 0x110   :  { %4533 = vmatprep.subr.bf16.mxu0 %v4532_v48  ;;  %4565 = vmatprep.subr.bf16.mxu1 %v4564_v49  ;;  %v4600_v44 = vpack.c.bf16 %v1241_v42, %v1240_v41 }
 0x111   :  { %3561 = vmatmul.mubr.f32.gmra.mrb[2].mxu0 %v739_v55  ;;  %3599 = vmatmul.mubr.f32.gmra.mrb[2].mxu1 %v739_v55  ;;  %v1411_v55 = vld [vmem:[#allocation10 + $0x840] sm:$0xff] }
 0x112   :  { %3633 = vmatprep.mubr.f32.mxu0 %v952_v60  ;;  %3671 = vmatprep.mubr.f32.mxu1 %v952_v60  ;;  %v1247_v60 = vld [vmem:[#allocation10 + $0x5d8] sm:$0xff] }
 0x113   :  { %4535 = vmatpush3.bf16.msra.mxu0 %v4532_v48  ;;  %4567 = vmatpush3.bf16.msra.mxu1 %v4564_v49  ;;  %v1243_v48 = vld [vmem:[#allocation10 + $0x5b8] sm:$0xff]  ;;  %v1409_v49 = vld [vmem:[#allocation10 + $0x830] sm:$0xff]  ;;  %v4612_v62 = vpack.c.bf16 %v1247_v60, %v1246_v59 }
 0x114   :  { %4537 = vmatprep.subr.bf16.mxu0 %v4536_v56  ;;  %4569 = vmatprep.subr.bf16.mxu1 %v4568_v57  ;;  %v4604_v50 = vpack.c.bf16 %v1243_v48, %v1242_v47  ;;  %v4668_v52 = vpack.c.bf16 %v1410_v51, %v1409_v49  ;;  %v1204_v49 = vld [vmem:[#allocation10 + $0x520] sm:$0xff]  ;;  %v1223_v59 = vld [vmem:[#allocation10 + $0x7b0] sm:$0xff]  ;;  %v1224_v60 = vld [vmem:[#allocation10 + $0x7b8] sm:$0xff] }
 0x117   :  { %4539 = vmatpush3.bf16.msra.mxu0 %v4536_v56  ;;  %4571 = vmatpush3.bf16.msra.mxu1 %v4568_v57  ;;  %v4608_v56 = vpack.c.bf16 %v1245_v54, %v1244_v53  ;;  %v1412_v57 = vld [vmem:[#allocation10 + $0x848] sm:$0xff]  ;;  %v1221_v53 = vld [vmem:[#allocation10 + $0x7a0] sm:$0xff] }
 0x118   :  { %4541 = vmatprep.subr.bf16.mxu0 %v4540_v63  ;;  %4573 = vmatprep.subr.bf16.mxu1 %v4572_v1  ;;  %v4672_v58 = vpack.c.bf16 %v1412_v57, %v1411_v55  ;;  %v1222_v54 = vld [vmem:[#allocation10 + $0x7a8] sm:$0xff]  ;;  %v1206_v57 = vld [vmem:[#allocation10 + $0x530] sm:$0xff] }
 0x11b   :  { %4543 = vmatpush3.bf16.msra.mxu0 %v4540_v63  ;;  %4575 = vmatpush3.bf16.msra.mxu1 %v4572_v1  ;;  %v1414_v63 = vld [vmem:[#allocation10 + $0x858] sm:$0xff]  ;;  %v1248_v1 = vld [vmem:[#allocation10 + $0x5e0] sm:$0xff] }
 0x11c   :  { %4545 = vmatprep.subr.bf16.mxu0 %v4544_v6  ;;  %4577 = vmatprep.subr.bf16.mxu1 %v4576_v7  ;;  %v4676_v3 = vpack.c.bf16 %v1414_v63, %v1413_v61  ;;  %v4616_v4 = vpack.c.bf16 %v1249_v2, %v1248_v1  ;;  %v1208_v63 = vld [vmem:[#allocation10 + $0x540] sm:$0xff]  ;;  %v1209_v1 = vld [vmem:[#allocation10 + $0x548] sm:$0xff] }
 0x11d   :  { %v1225_v2 = vld [vmem:[#allocation10 + $0x7c0] sm:$0xff] }
 0x11f   :  { %4547 = vmatpush3.bf16.msra.mxu0 %v4544_v6  ;;  %4579 = vmatpush3.bf16.msra.mxu1 %v4576_v7  ;;  %v1416_v6 = vld [vmem:[#allocation10 + $0x868] sm:$0xff]  ;;  %v1250_v7 = vld [vmem:[#allocation10 + $0x5f0] sm:$0xff] }
 0x120   :  { %4549 = vmatprep.subr.bf16.mxu0 %v4548_v12  ;;  %4581 = vmatprep.subr.bf16.mxu1 %v4580_v13  ;;  %v4680_v8 = vpack.c.bf16 %v1416_v6, %v1415_v5  ;;  %v1210_v6 = vld [vmem:[#allocation10 + $0x550] sm:$0xff] }
 0x123   :  { %4551 = vmatpush3.bf16.msra.mxu0 %v4548_v12  ;;  %4583 = vmatpush3.bf16.msra.mxu1 %v4580_v13  ;;  %v4620_v12 = vpack.c.bf16 %v1251_v9, %v1250_v7  ;;  %v4684_v13 = vpack.c.bf16 %v1418_v11, %v1417_v10  ;;  %v1211_v7 = vld [vmem:[#allocation10 + $0x558] sm:$0xff] }
 0x124   :  { %4553 = vmatprep.subr.bf16.mxu0 %v4552_v18  ;;  %4585 = vmatprep.subr.bf16.mxu1 %v4584_v19  ;;  %v1228_v9 = vld [vmem:[#allocation10 + $0x7d8] sm:$0xff]  ;;  %v4644_v10 = vpack.c.bf16 %v1211_v7, %v1210_v6  ;;  %v1680_v7 = vld [vmem:[#allocation10 + $0x8f0] sm:$0xff] }
 0x125   :  { %v1587_v6 = vld [vmem:[#allocation10 + $0x678] sm:$0xff] }
 0x127   :  { %4555 = vmatpush3.bf16.msra.mxu0 %v4552_v18  ;;  %4587 = vmatpush3.bf16.msra.mxu1 %v4584_v19  ;;  %v1218_v18 = vld [vmem:[#allocation10 + $0x788] sm:$0xff] }
 0x128   :  { %4557 = vmatprep.subr.bf16.mxu0 %v4556_v24  ;;  %4589 = vmatprep.subr.bf16.mxu1 %v4588_v25  ;;  %v4688_v19 = vpack.c.bf16 %v1218_v18, %v1217_v16  ;;  %v1214_v18 = vld [vmem:[#allocation10 + $0x570] sm:$0xff] }
 0x12b   :  { %4559 = vmatpush3.bf16.msra.mxu0 %v4556_v24  ;;  %4591 = vmatpush3.bf16.msra.mxu1 %v4588_v25 }
 0x12c   :  { %4593 = vmatprep.subr.bf16.mxu0 %v4592_v30  ;;  %4657 = vmatprep.subr.bf16.mxu1 %v4656_v31 }
 0x12e   :  { %3634 = vmatmul.mubr.f32.vlgmr.msra.gmra.mrb[0].mxu0 %v953_v32  ;;  %3672 = vmatmul.mubr.f32.vlgmr.msra.gmra.mrb[0].mxu1 %v953_v32 }
 0x12f   :  { %3636 = vmatprep.mubr.f32.mxu0 %v954_v33  ;;  %3674 = vmatprep.mubr.f32.mxu1 %v954_v33 }
 0x130   :  { %4595 = vmatpush3.bf16.msra.mxu0 %v4592_v30  ;;  %4659 = vmatpush3.bf16.msra.mxu1 %v4656_v31 }
 0x131   :  { %4597 = vmatprep.subr.bf16.mxu0 %v4596_v38  ;;  %4661 = vmatprep.subr.bf16.mxu1 %v4660_v40 }
 0x132   :  { %3637 = vmatmul.mubr.f32.gmra.mrb[2].mxu0 %v955_v34  ;;  %3675 = vmatmul.mubr.f32.gmra.mrb[2].mxu1 %v955_v34  ;;  %v2796_v34 = vld [vmem:[#allocation10 + $0xd80] ss:$0 sm:$0xff] }
 0x134   :  { %4599 = vmatpush3.bf16.msra.mxu0 %v4596_v38  ;;  %4663 = vmatpush3.bf16.msra.mxu1 %v4660_v40 }
 0x135   :  { %4601 = vmatprep.subr.bf16.mxu0 %v4600_v44  ;;  %4665 = vmatprep.subr.bf16.mxu1 %v4664_v46 }
 0x138   :  { %4603 = vmatpush3.bf16.msra.mxu0 %v4600_v44  ;;  %4667 = vmatpush3.bf16.msra.mxu1 %v4664_v46  ;;  %v1203_v44 = vld [vmem:[#allocation10 + $0x518] sm:$0xff] }
 0x139   :  { %4605 = vmatprep.subr.bf16.mxu0 %v4604_v50  ;;  %4669 = vmatprep.subr.bf16.mxu1 %v4668_v52  ;;  %v1220_v46 = vld [vmem:[#allocation10 + $0x798] sm:$0xff] }
 0x13a   :  { %v4692_v51 = vpack.c.bf16 %v1220_v46, %v1219_v45  ;;  %v1579_v45 = vld [vmem:[#allocation10 + $0x638] sm:$0xff]  ;;  %v1672_v46 = vld [vmem:[#allocation10 + $0x8b0] sm:$0xff] }
 0x13c   :  { %4607 = vmatpush3.bf16.msra.mxu0 %v4604_v50  ;;  %4671 = vmatpush3.bf16.msra.mxu1 %v4668_v52  ;;  %v4628_v50 = vpack.c.bf16 %v1203_v44, %v1202_v43  ;;  %v1205_v52 = vld [vmem:[#allocation10 + $0x528] sm:$0xff]  ;;  %v1578_v44 = vld [vmem:[#allocation10 + $0x630] sm:$0xff] }
 0x13d   :  { %4609 = vmatprep.subr.bf16.mxu0 %v4608_v56  ;;  %4673 = vmatprep.subr.bf16.mxu1 %v4672_v58  ;;  %v4632_v55 = vpack.c.bf16 %v1205_v52, %v1204_v49  ;;  %v1674_v52 = vld [vmem:[#allocation10 + $0x8c0] sm:$0xff] }
 0x140   :  { %4611 = vmatpush3.bf16.msra.mxu0 %v4608_v56  ;;  %4675 = vmatpush3.bf16.msra.mxu1 %v4672_v58  ;;  %v4696_v56 = vpack.c.bf16 %v1222_v54, %v1221_v53  ;;  %v1207_v58 = vld [vmem:[#allocation10 + $0x538] sm:$0xff]  ;;  %v1675_v53 = vld [vmem:[#allocation10 + $0x8c8] sm:$0xff] }
 0x141   :  { %4613 = vmatprep.subr.bf16.mxu0 %v4612_v62  ;;  %4677 = vmatprep.subr.bf16.mxu1 %v4676_v3  ;;  %v4636_v61 = vpack.c.bf16 %v1207_v58, %v1206_v57  ;;  %v1583_v57 = vld [vmem:[#allocation10 + $0x658] sm:$0xff]  ;;  %v1676_v58 = vld [vmem:[#allocation10 + $0x8d0] sm:$0xff] }
 0x144   :  { %4615 = vmatpush3.bf16.msra.mxu0 %v4612_v62  ;;  %4679 = vmatpush3.bf16.msra.mxu1 %v4676_v3  ;;  %v4700_v62 = vpack.c.bf16 %v1224_v60, %v1223_v59  ;;  %v1226_v3 = vld [vmem:[#allocation10 + $0x7c8] sm:$0xff]  ;;  %v1677_v59 = vld [vmem:[#allocation10 + $0x8d8] sm:$0xff] }
 0x145   :  { %4617 = vmatprep.subr.bf16.mxu0 %v4616_v4  ;;  %4681 = vmatprep.subr.bf16.mxu1 %v4680_v8  ;;  %v4704_v5 = vpack.c.bf16 %v1226_v3, %v1225_v2  ;;  %v1679_v2 = vld [vmem:[#allocation10 + $0x8e8] sm:$0xff] }
 0x148   :  { %4619 = vmatpush3.bf16.msra.mxu0 %v4616_v4  ;;  %4683 = vmatpush3.bf16.msra.mxu1 %v4680_v8  ;;  %v4640_v4 = vpack.c.bf16 %v1209_v1, %v1208_v63  ;;  %v1227_v8 = vld [vmem:[#allocation10 + $0x7d0] sm:$0xff]  ;;  %v1585_v63 = vld [vmem:[#allocation10 + $0x668] sm:$0xff]  ;;  %v1678_v1 = vld [vmem:[#allocation10 + $0x8e0] sm:$0xff] }
 0x149   :  { %4621 = vmatprep.subr.bf16.mxu0 %v4620_v12  ;;  %4685 = vmatprep.subr.bf16.mxu1 %v4684_v13  ;;  %v4708_v11 = vpack.c.bf16 %v1228_v9, %v1227_v8  ;;  %v1681_v8 = vld [vmem:[#allocation10 + $0x8f8] sm:$0xff] }
 0x14c   :  { %4623 = vmatpush3.bf16.msra.mxu0 %v4620_v12  ;;  %4687 = vmatpush3.bf16.msra.mxu1 %v4684_v13  ;;  %v1212_v12 = vld [vmem:[#allocation10 + $0x560] sm:$0xff]  ;;  %v1213_v13 = vld [vmem:[#allocation10 + $0x568] sm:$0xff] }
 0x14d   :  { %4625 = vmatprep.subr.bf16.mxu0 %v4624_v17  ;;  %4689 = vmatprep.subr.bf16.mxu1 %v4688_v19  ;;  %v4648_v16 = vpack.c.bf16 %v1213_v13, %v1212_v12  ;;  %v1763_v12 = vld [vmem:[#allocation10 + $0x688] sm:$0xff]  ;;  %v1856_v13 = vld [vmem:[#allocation10 + $0x900] sm:$0xff] }
 0x201   :  { %v3635_v20 = vpop.f32.mrb[0].mxu0  ;;  %v3673_v21 = vpop.f32.mrb[0].mxu1 }
 0x202   :  { %v1169_v22 = vmax.f32 %v3635_v20, %v3673_v21  ;;  %v1039_v23 = vpop.f32.mrb[1].mxu0  ;;  %v1145_v24 = vpop.f32.mrb[1].mxu1  ;;  %v1231_v20 = vld [vmem:[#allocation10 + $0x7f0] sm:$0xff]  ;;  %v1232_v21 = vld [vmem:[#allocation10 + $0x7f8] sm:$0xff] }
 0x203   :  { %v1168_v25 = vmax.f32 %v1039_v23, %v1145_v24  ;;  %v4716_v23 = vpack.c.bf16 %v1232_v21, %v1231_v20  ;;  %v1572_v24 = vld [vmem:[#allocation10 + $0x600] sm:$0xff]  ;;  %v1859_v20 = vld [vmem:[#allocation10 + $0x918] sm:$0xff] }
 0x204   :  { %1173 = vst [vmem:[#allocation3 + $0x8] sm:$0xff] %v1169_v22 }
 0x205   :  { %1172 = vst [vmem:[#allocation3] sm:$0xff] %v1168_v25  ;;  %v3638_v26 = vpop.f32.mrb[2].mxu0  ;;  %v3676_v27 = vpop.f32.mrb[2].mxu1  ;;  %v1573_v25 = vld [vmem:[#allocation10 + $0x608] sm:$0xff] }
 0x206   :  { %v1171_v28 = vmax.f32 %v3638_v26, %v3676_v27  ;;  %v1049_v29 = vpop.f32.mrb[3].mxu0  ;;  %v1155_v30 = vpop.f32.mrb[3].mxu1  ;;  %v1666_v26 = vld [vmem:[#allocation10 + $0x880] sm:$0xff]  ;;  %v1667_v27 = vld [vmem:[#allocation10 + $0x888] sm:$0xff] }
 0x207   :  { %v1170_v31 = vmax.f32 %v1049_v29, %v1155_v30  ;;  %v4752_v29 = vpack.c.bf16 %v1667_v27, %v1666_v26  ;;  %v1574_v30 = vld [vmem:[#allocation10 + $0x610] sm:$0xff]  ;;  %v1860_v26 = vld [vmem:[#allocation10 + $0x920] sm:$0xff]  ;;  %v1861_v27 = vld [vmem:[#allocation10 + $0x928] sm:$0xff] }
 0x208   :  { %1175 = vst [vmem:[#allocation3 + $0x18] sm:$0xf] %v1171_v28  ;;  %v4720_v28 = vpack.c.bf16 %v1573_v25, %v1572_v24  ;;  %v1767_v24 = vld [vmem:[#allocation10 + $0x6a8] sm:$0xff] }
 0x209   :  { %1174 = vst [vmem:[#allocation3 + $0x10] sm:$0xff] %v1170_v31  ;;  %v1575_v31 = vld [vmem:[#allocation10 + $0x618] sm:$0xff] }
 0x20c   :  { %v1178_v32 = vld [vmem:[#allocation3] ss:$2 sm:$0xff]  ;;  %v1182_v33 = vld [vmem:[#allocation3 + $0x1] ss:$2 sm:$0xff] }
 0x20d   :  { %v1185_v35 = vmax.f32 %v1178_v32, %v1182_v33  ;;  %v1668_v32 = vld [vmem:[#allocation10 + $0x890] sm:$0xff]  ;;  %v1669_v33 = vld [vmem:[#allocation10 + $0x898] sm:$0xff] }
 0x20f   :  { %v1191_v36 = vadd.f32 %v2796_v34, %v1185_v35  ;;  %v4724_v35 = vpack.c.bf16 %v1575_v31, %v1574_v30  ;;  %v4824_v30 = vpack.c.bf16 %v1861_v27, %v1860_v26  ;;  %v1768_v31 = vld [vmem:[#allocation10 + $0x6b0] sm:$0xff]  ;;  %v2054_v26 = vld [vmem:[#allocation10 + $0x9c0] sm:$0xff]  ;;  %v2055_v27 = vld [vmem:[#allocation10 + $0x9c8] sm:$0xff] }
 0x210   :  { %v1180_v37 = vld [vmem:[#allocation3 + $0x10] ss:$2 sm:$0x3f]  ;;  %v1184_v38 = vld [vmem:[#allocation3 + $0x11] ss:$2 sm:$0x3f] }
 0x211   :  { %v1186_v39 = vmax.f32 %v1180_v37, %v1184_v38  ;;  %v1193_v40 = vmax.f32 %v1191_v36, 0.0  ;;  %v4756_v36 = vpack.c.bf16 %v1669_v33, %v1668_v32  ;;  %v1576_v37 = vld [vmem:[#allocation10 + $0x620] sm:$0xff]  ;;  %v1577_v38 = vld [vmem:[#allocation10 + $0x628] sm:$0xff]  ;;  %v1769_v32 = vld [vmem:[#allocation10 + $0x6b8] sm:$0xff] }
 0x212   :  { %v1862_v33 = vld [vmem:[#allocation10 + $0x930] sm:$0xff] }
 0x213   :  { %v1192_v41 = vadd.f32 %v2796_v34, %v1186_v39  ;;  %1195 = vst [vmem:[#allocation4] sm:$0xff] %v1193_v40 }
 0x215   :  { %v1194_v42 = vmax.f32 %v1192_v41, 0.0  ;;  %v1671_v41 = vld [vmem:[#allocation10 + $0x8a8] sm:$0xff] }
 0x217   :  { %1196 = vst [vmem:[#allocation4 + $0x8] sm:$0x3f] %v1194_v42  ;;  %v4728_v42 = vpack.c.bf16 %v1577_v38, %v1576_v37  ;;  %v1770_v37 = vld [vmem:[#allocation10 + $0x6c0] sm:$0xff]  ;;  %v1771_v38 = vld [vmem:[#allocation10 + $0x6c8] sm:$0xff] }
 0x21e   :  { %v1233_v47 = vld [vmem:[#allocation4 + $0x1] sm:$0xff]  ;;  %v1234_v48 = vld [vmem:[#allocation4 + $0x9] sm:$0x3] }
 0x21f   :  { %3709 = vmatprep.mubr.f32.mxu0 %v1233_v47  ;;  %3779 = vmatprep.mubr.f32.mxu1 %v1233_v47  ;;  %v1198_v34 = vld [vmem:[#allocation4 + $0x8] sm:$0x3]  ;;  %v1673_v47 = vld [vmem:[#allocation10 + $0x8b8] sm:$0xff]  ;;  %v1570_v21 = vld [vmem:[#allocation4 + $0xa] sm:$0x3] }
 0x220   :  { %3710 = vmatmul.mubr.f32.vlgmr.msra.gmra.mrb[4].mxu0 %v1234_v48  ;;  %3780 = vmatmul.mubr.f32.vlgmr.msra.gmra.mrb[4].mxu1 %v1234_v48  ;;  %v1569_v39 = vld [vmem:[#allocation4 + $0x2] sm:$0xff]  ;;  %v4732_v48 = vpack.c.bf16 %v1579_v45, %v1578_v44  ;;  %v4764_v49 = vpack.c.bf16 %v1673_v47, %v1672_v46  ;;  %v1866_v45 = vld [vmem:[#allocation10 + $0x950] sm:$0xff] }
 0x221   :  { %4627 = vmatpush3.bf16.msra.mxu0 %v4624_v17  ;;  %4691 = vmatpush3.bf16.msra.mxu1 %v4688_v19  ;;  %v4712_v17 = vpack.c.bf16 %v1230_v15, %v1229_v14  ;;  %v1215_v19 = vld [vmem:[#allocation10 + $0x578] sm:$0xff]  ;;  %v1857_v14 = vld [vmem:[#allocation10 + $0x908] sm:$0xff] }
 0x222   :  { %3744 = vmatprep.mubr.f32.mxu0 %v1193_v40  ;;  %3814 = vmatprep.mubr.f32.mxu1 %v1193_v40  ;;  %v4652_v22 = vpack.c.bf16 %v1215_v19, %v1214_v18  ;;  %v1670_v40 = vld [vmem:[#allocation10 + $0x8a0] sm:$0xff]  ;;  %v1765_v18 = vld [vmem:[#allocation10 + $0x698] sm:$0xff]  ;;  %v1858_v19 = vld [vmem:[#allocation10 + $0x910] sm:$0xff] }
 0x223   :  { %4629 = vmatprep.subr.bf16.mxu0 %v4628_v50  ;;  %4693 = vmatprep.subr.bf16.mxu1 %v4692_v51  ;;  %v4760_v43 = vpack.c.bf16 %v1671_v41, %v1670_v40  ;;  %v4820_v25 = vpack.c.bf16 %v1859_v20, %v1858_v19  ;;  %v1865_v40 = vld [vmem:[#allocation10 + $0x948] sm:$0xff]  ;;  %v4800_v41 = vpack.c.bf16 %v1771_v38, %v1770_v37  ;;  %v1773_v44 = vld [vmem:[#allocation10 + $0x6d8] sm:$0xff]  ;;  %v2052_v20 = vld [vmem:[#allocation10 + $0x9b0] sm:$0xff] }
 0x224   :  { %v1867_v46 = vld [vmem:[#allocation10 + $0x958] sm:$0xff]  ;;  %v1965_v37 = vld [vmem:[#allocation10 + $0x768] sm:$0xff]  ;;  %v2058_v38 = vld [vmem:[#allocation10 + $0x9e0] sm:$0xff] }
 0x225   :  { %4631 = vmatpush3.bf16.msra.mxu0 %v4628_v50  ;;  %4695 = vmatpush3.bf16.msra.mxu1 %v4692_v51  ;;  %v1580_v50 = vld [vmem:[#allocation10 + $0x640] sm:$0xff]  ;;  %v1581_v51 = vld [vmem:[#allocation10 + $0x648] sm:$0xff]  ;;  %v1959_v19 = vld [vmem:[#allocation10 + $0x738] sm:$0xff] }
 0x226   :  { %4633 = vmatprep.subr.bf16.mxu0 %v4632_v55  ;;  %4697 = vmatprep.subr.bf16.mxu1 %v4696_v56  ;;  %v4736_v54 = vpack.c.bf16 %v1581_v51, %v1580_v50  ;;  %v1775_v50 = vld [vmem:[#allocation10 + $0x6e8] sm:$0xff]  ;;  %v1868_v51 = vld [vmem:[#allocation10 + $0x960] sm:$0xff] }
 0x229   :  { %4635 = vmatpush3.bf16.msra.mxu0 %v4632_v55  ;;  %4699 = vmatpush3.bf16.msra.mxu1 %v4696_v56  ;;  %v4768_v55 = vpack.c.bf16 %v1675_v53, %v1674_v52  ;;  %v1582_v56 = vld [vmem:[#allocation10 + $0x650] sm:$0xff]  ;;  %v1869_v52 = vld [vmem:[#allocation10 + $0x968] sm:$0xff] }
 0x22a   :  { %4637 = vmatprep.subr.bf16.mxu0 %v4636_v61  ;;  %4701 = vmatprep.subr.bf16.mxu1 %v4700_v62  ;;  %v4740_v60 = vpack.c.bf16 %v1583_v57, %v1582_v56  ;;  %v1777_v56 = vld [vmem:[#allocation10 + $0x6f8] sm:$0xff]  ;;  %v1870_v57 = vld [vmem:[#allocation10 + $0x970] sm:$0xff] }
 0x22d   :  { %4639 = vmatpush3.bf16.msra.mxu0 %v4636_v61  ;;  %4703 = vmatpush3.bf16.msra.mxu1 %v4700_v62  ;;  %v4772_v61 = vpack.c.bf16 %v1677_v59, %v1676_v58  ;;  %v1584_v62 = vld [vmem:[#allocation10 + $0x660] sm:$0xff]  ;;  %v1871_v58 = vld [vmem:[#allocation10 + $0x978] sm:$0xff] }
 0x22e   :  { %4641 = vmatprep.subr.bf16.mxu0 %v4640_v4  ;;  %4705 = vmatprep.subr.bf16.mxu1 %v4704_v5  ;;  %v4744_v3 = vpack.c.bf16 %v1585_v63, %v1584_v62  ;;  %v1953_v62 = vld [vmem:[#allocation10 + $0x708] sm:$0xff]  ;;  %v2046_v63 = vld [vmem:[#allocation10 + $0x980] sm:$0xff] }
 0x231   :  { %4643 = vmatpush3.bf16.msra.mxu0 %v4640_v4  ;;  %4707 = vmatpush3.bf16.msra.mxu1 %v4704_v5  ;;  %v4776_v4 = vpack.c.bf16 %v1679_v2, %v1678_v1  ;;  %v1586_v5 = vld [vmem:[#allocation10 + $0x670] sm:$0xff]  ;;  %v2047_v1 = vld [vmem:[#allocation10 + $0x988] sm:$0xff] }
 0x232   :  { %4645 = vmatprep.subr.bf16.mxu0 %v4644_v10  ;;  %4709 = vmatprep.subr.bf16.mxu1 %v4708_v11  ;;  %v4748_v9 = vpack.c.bf16 %v1587_v6, %v1586_v5  ;;  %v1955_v5 = vld [vmem:[#allocation10 + $0x718] sm:$0xff]  ;;  %v2048_v6 = vld [vmem:[#allocation10 + $0x990] sm:$0xff] }
 0x235   :  { %4647 = vmatpush3.bf16.msra.mxu0 %v4644_v10  ;;  %4711 = vmatpush3.bf16.msra.mxu1 %v4708_v11  ;;  %v4780_v10 = vpack.c.bf16 %v1681_v8, %v1680_v7  ;;  %v1762_v11 = vld [vmem:[#allocation10 + $0x680] sm:$0xff]  ;;  %v2049_v7 = vld [vmem:[#allocation10 + $0x998] sm:$0xff] }
 0x236   :  { %4649 = vmatprep.subr.bf16.mxu0 %v4648_v16  ;;  %4713 = vmatprep.subr.bf16.mxu1 %v4712_v17  ;;  %v4784_v15 = vpack.c.bf16 %v1763_v12, %v1762_v11  ;;  %v1760_v8 = vld [vmem:[#allocation4 + $0xb] sm:$0x3]  ;;  %v1957_v11 = vld [vmem:[#allocation10 + $0x728] sm:$0xff]  ;;  %v4884_v12 = vpack.c.bf16 %v2049_v7, %v2048_v6  ;;  %v2182_v6 = vld [vmem:[#allocation10 + $0xab8] sm:$0xff] }
 0x239   :  { %4651 = vmatpush3.bf16.msra.mxu0 %v4648_v16  ;;  %4715 = vmatpush3.bf16.msra.mxu1 %v4712_v17  ;;  %v4816_v16 = vpack.c.bf16 %v1857_v14, %v1856_v13  ;;  %v1764_v17 = vld [vmem:[#allocation10 + $0x690] sm:$0xff]  ;;  %v2050_v13 = vld [vmem:[#allocation10 + $0x9a0] sm:$0xff]  ;;  %v2051_v14 = vld [vmem:[#allocation10 + $0x9a8] sm:$0xff] }
 0x23a   :  { %4653 = vmatprep.subr.bf16.mxu0 %v4652_v22  ;;  %4717 = vmatprep.subr.bf16.mxu1 %v4716_v23 }
 0x23d   :  { %4655 = vmatpush3.bf16.msra.mxu0 %v4652_v22  ;;  %4719 = vmatpush3.bf16.msra.mxu1 %v4716_v23  ;;  %v4788_v22 = vpack.c.bf16 %v1765_v18, %v1764_v17  ;;  %v1766_v23 = vld [vmem:[#allocation10 + $0x6a0] sm:$0xff]  ;;  %v4888_v17 = vpack.c.bf16 %v2051_v14, %v2050_v13  ;;  %v1958_v18 = vld [vmem:[#allocation10 + $0x730] sm:$0xff] }
 0x23e   :  { %4721 = vmatprep.subr.bf16.mxu0 %v4720_v28  ;;  %4753 = vmatprep.subr.bf16.mxu1 %v4752_v29  ;;  %v2165_v13 = vld [vmem:[#allocation10 + $0xa40] sm:$0xff] }
 0x240   :  { %3745 = vmatmul.mubr.f32.vlgmr.msra.gmra.mrb[4].mxu0 %v1198_v34  ;;  %3815 = vmatmul.mubr.f32.vlgmr.msra.gmra.mrb[4].mxu1 %v1198_v34  ;;  %v1863_v34 = vld [vmem:[#allocation10 + $0x938] sm:$0xff] }
 0x241   :  { %4723 = vmatpush3.bf16.msra.mxu0 %v4720_v28  ;;  %3849 = vmatprep.mubr.f32.mxu0 %v1569_v39  ;;  %v1759_v28 = vld [vmem:[#allocation4 + $0x3] sm:$0xff] }
 0x242   :  { %4755 = vmatpush3.bf16.msra.mxu1 %v4752_v29  ;;  %3884 = vmatprep.mubr.f32.mxu1 %v1569_v39  ;;  %v4792_v29 = vpack.c.bf16 %v1767_v24, %v1766_v23  ;;  %v1864_v39 = vld [vmem:[#allocation10 + $0x940] sm:$0xff] }
 0x243   :  { %4725 = vmatprep.subr.bf16.mxu0 %v4724_v35  ;;  %4757 = vmatprep.subr.bf16.mxu1 %v4756_v36  ;;  %v1960_v24 = vld [vmem:[#allocation10 + $0x740] sm:$0xff] }
 0x245   :  { %4727 = vmatpush3.bf16.msra.mxu0 %v4724_v35  ;;  %v4796_v35 = vpack.c.bf16 %v1769_v32, %v1768_v31  ;;  %v1963_v31 = vld [vmem:[#allocation10 + $0x758] sm:$0xff]  ;;  %v2056_v32 = vld [vmem:[#allocation10 + $0x9d0] sm:$0xff] }
 0x246   :  { %4759 = vmatpush3.bf16.msra.mxu1 %v4756_v36  ;;  %4729 = vmatprep.subr.bf16.mxu0 %v4728_v42  ;;  %v4828_v36 = vpack.c.bf16 %v1863_v34, %v1862_v33  ;;  %v2057_v33 = vld [vmem:[#allocation10 + $0x9d8] sm:$0xff] }
 0x247   :  { %4761 = vmatprep.subr.bf16.mxu1 %v4760_v43 }
 0x249   :  { %4731 = vmatpush3.bf16.msra.mxu0 %v4728_v42  ;;  %v4832_v42 = vpack.c.bf16 %v1865_v40, %v1864_v39  ;;  %v2059_v39 = vld [vmem:[#allocation10 + $0x9e8] sm:$0xff] }
 0x24a   :  { %4763 = vmatpush3.bf16.msra.mxu1 %v4760_v43  ;;  %4733 = vmatprep.subr.bf16.mxu0 %v4732_v48  ;;  %v1772_v43 = vld [vmem:[#allocation10 + $0x6d0] sm:$0xff] }
 0x24b   :  { %4765 = vmatprep.subr.bf16.mxu1 %v4764_v49  ;;  %v4804_v47 = vpack.c.bf16 %v1773_v44, %v1772_v43  ;;  %v1967_v43 = vld [vmem:[#allocation10 + $0x778] sm:$0xff]  ;;  %v2060_v44 = vld [vmem:[#allocation10 + $0x9f0] sm:$0xff] }
 0x24d   :  { %4735 = vmatpush3.bf16.msra.mxu0 %v4732_v48  ;;  %v4836_v48 = vpack.c.bf16 %v1867_v46, %v1866_v45  ;;  %v2061_v45 = vld [vmem:[#allocation10 + $0x9f8] sm:$0xff] }
 0x24e   :  { %4767 = vmatpush3.bf16.msra.mxu1 %v4764_v49  ;;  %4737 = vmatprep.subr.bf16.mxu0 %v4736_v54  ;;  %v1774_v49 = vld [vmem:[#allocation10 + $0x6e0] sm:$0xff] }
 0x24f   :  { %4769 = vmatprep.subr.bf16.mxu1 %v4768_v55  ;;  %v4808_v53 = vpack.c.bf16 %v1775_v50, %v1774_v49  ;;  %v2176_v49 = vld [vmem:[#allocation10 + $0xa88] sm:$0xff]  ;;  %v2157_v50 = vld [vmem:[#allocation10 + $0xa00] sm:$0xff] }
 0x251   :  { %4739 = vmatpush3.bf16.msra.mxu0 %v4736_v54  ;;  %v4840_v54 = vpack.c.bf16 %v1869_v52, %v1868_v51  ;;  %v2158_v51 = vld [vmem:[#allocation10 + $0xa08] sm:$0xff] }
 0x252   :  { %4771 = vmatpush3.bf16.msra.mxu1 %v4768_v55  ;;  %4741 = vmatprep.subr.bf16.mxu0 %v4740_v60  ;;  %v1776_v55 = vld [vmem:[#allocation10 + $0x6f0] sm:$0xff] }
 0x253   :  { %4773 = vmatprep.subr.bf16.mxu1 %v4772_v61  ;;  %v4812_v59 = vpack.c.bf16 %v1777_v56, %v1776_v55  ;;  %v2177_v55 = vld [vmem:[#allocation10 + $0xa90] sm:$0xff]  ;;  %v2178_v56 = vld [vmem:[#allocation10 + $0xa98] sm:$0xff] }
 0x255   :  { %4743 = vmatpush3.bf16.msra.mxu0 %v4740_v60  ;;  %v4844_v60 = vpack.c.bf16 %v1871_v58, %v1870_v57  ;;  %v1950_v57 = vld [vmem:[#allocation4 + $0xc] sm:$0x3]  ;;  %v2159_v58 = vld [vmem:[#allocation10 + $0xa10] sm:$0xff] }
 0x256   :  { %4775 = vmatpush3.bf16.msra.mxu1 %v4772_v61  ;;  %4745 = vmatprep.subr.bf16.mxu0 %v4744_v3  ;;  %v1952_v61 = vld [vmem:[#allocation10 + $0x700] sm:$0xff] }
 0x257   :  { %4777 = vmatprep.subr.bf16.mxu1 %v4776_v4  ;;  %v4848_v2 = vpack.c.bf16 %v1953_v62, %v1952_v61  ;;  %v2179_v62 = vld [vmem:[#allocation10 + $0xaa0] sm:$0xff] }
 0x259   :  { %4747 = vmatpush3.bf16.msra.mxu0 %v4744_v3  ;;  %v4880_v3 = vpack.c.bf16 %v2047_v1, %v2046_v63  ;;  %v2180_v63 = vld [vmem:[#allocation10 + $0xaa8] sm:$0xff]  ;;  %v2161_v1 = vld [vmem:[#allocation10 + $0xa20] sm:$0xff] }
 0x25a   :  { %4779 = vmatpush3.bf16.msra.mxu1 %v4776_v4  ;;  %4749 = vmatprep.subr.bf16.mxu0 %v4748_v9  ;;  %v1954_v4 = vld [vmem:[#allocation10 + $0x710] sm:$0xff] }
 0x25b   :  { %4781 = vmatprep.subr.bf16.mxu1 %v4780_v10 }
 0x25d   :  { %4751 = vmatpush3.bf16.msra.mxu0 %v4748_v9  ;;  %v4852_v9 = vpack.c.bf16 %v1955_v5, %v1954_v4  ;;  %v2181_v5 = vld [vmem:[#allocation10 + $0xab0] sm:$0xff] }
 0x25e   :  { %4783 = vmatpush3.bf16.msra.mxu1 %v4780_v10  ;;  %4785 = vmatprep.subr.bf16.mxu0 %v4784_v15  ;;  %v1956_v10 = vld [vmem:[#allocation10 + $0x720] sm:$0xff]  ;;  %v4922_v7 = vpack.c.bf16 %v2182_v6, %v2181_v5  ;;  %v2339_v5 = vld [vmem:[#allocation10 + $0xb30] sm:$0xff]  ;;  %v2340_v6 = vld [vmem:[#allocation10 + $0xb38] sm:$0xff] }
 0x25f   :  { %4817 = vmatprep.subr.bf16.mxu1 %v4816_v16 }
 0x260   :  { %3850 = vmatmul.mubr.f32.vlgmr.msra.gmra.mrb[4].mxu0 %v1570_v21 }
 0x261   :  { %3885 = vmatmul.mubr.f32.vlgmr.msra.gmra.mrb[4].mxu1 %v1570_v21  ;;  %4787 = vmatpush3.bf16.msra.mxu0 %v4784_v15  ;;  %v1949_v15 = vld [vmem:[#allocation4 + $0x4] sm:$0xff] }
 0x262   :  { %3919 = vmatprep.mubr.f32.mxu0 %v1759_v28  ;;  %4819 = vmatpush3.bf16.msra.mxu1 %v4816_v16  ;;  %v4856_v16 = vpack.c.bf16 %v1957_v11, %v1956_v10  ;;  %v2053_v21 = vld [vmem:[#allocation10 + $0x9b8] sm:$0xff]  ;;  %v2183_v11 = vld [vmem:[#allocation10 + $0xac0] sm:$0xff] }
 0x263   :  { %3954 = vmatprep.mubr.f32.mxu1 %v1759_v28  ;;  %4789 = vmatprep.subr.bf16.mxu0 %v4788_v22  ;;  %v4892_v23 = vpack.c.bf16 %v2053_v21, %v2052_v20  ;;  %v2168_v21 = vld [vmem:[#allocation10 + $0xa58] sm:$0xff] }
 0x264   :  { %4821 = vmatprep.subr.bf16.mxu1 %v4820_v25 }
 0x265   :  { %4791 = vmatpush3.bf16.msra.mxu0 %v4788_v22  ;;  %v4860_v22 = vpack.c.bf16 %v1959_v19, %v1958_v18  ;;  %v2186_v18 = vld [vmem:[#allocation10 + $0xad8] sm:$0xff]  ;;  %v2167_v19 = vld [vmem:[#allocation10 + $0xa50] sm:$0xff] }
 0x266   :  { %4823 = vmatpush3.bf16.msra.mxu1 %v4820_v25  ;;  %4793 = vmatprep.subr.bf16.mxu0 %v4792_v29  ;;  %v1961_v25 = vld [vmem:[#allocation10 + $0x748] sm:$0xff] }
 0x267   :  { %4825 = vmatprep.subr.bf16.mxu1 %v4824_v30  ;;  %v4864_v28 = vpack.c.bf16 %v1961_v25, %v1960_v24  ;;  %v2188_v24 = vld [vmem:[#allocation10 + $0xae8] sm:$0xff]  ;;  %v2169_v25 = vld [vmem:[#allocation10 + $0xa60] sm:$0xff] }
 0x269   :  { %4795 = vmatpush3.bf16.msra.mxu0 %v4792_v29  ;;  %v4896_v29 = vpack.c.bf16 %v2055_v27, %v2054_v26  ;;  %v2170_v27 = vld [vmem:[#allocation10 + $0xa68] sm:$0xff] }
 0x26a   :  { %4827 = vmatpush3.bf16.msra.mxu1 %v4824_v30  ;;  %4797 = vmatprep.subr.bf16.mxu0 %v4796_v35  ;;  %v1962_v30 = vld [vmem:[#allocation10 + $0x750] sm:$0xff] }
 0x26b   :  { %4829 = vmatprep.subr.bf16.mxu1 %v4828_v36  ;;  %v4868_v34 = vpack.c.bf16 %v1963_v31, %v1962_v30  ;;  %v2190_v30 = vld [vmem:[#allocation10 + $0xaf8] sm:$0xff]  ;;  %v2171_v31 = vld [vmem:[#allocation10 + $0xa70] sm:$0xff] }
 0x26d   :  { %4799 = vmatpush3.bf16.msra.mxu0 %v4796_v35  ;;  %v4900_v35 = vpack.c.bf16 %v2057_v33, %v2056_v32  ;;  %v2172_v32 = vld [vmem:[#allocation10 + $0xa78] sm:$0xff] }
 0x26e   :  { %4831 = vmatpush3.bf16.msra.mxu1 %v4828_v36  ;;  %4801 = vmatprep.subr.bf16.mxu0 %v4800_v41  ;;  %v1964_v36 = vld [vmem:[#allocation10 + $0x760] sm:$0xff] }
 0x26f   :  { %4833 = vmatprep.subr.bf16.mxu1 %v4832_v42  ;;  %v4872_v40 = vpack.c.bf16 %v1965_v37, %v1964_v36 }
 0x271   :  { %4803 = vmatpush3.bf16.msra.mxu0 %v4800_v41  ;;  %v4904_v41 = vpack.c.bf16 %v2059_v39, %v2058_v38 }
 0x272   :  { %4835 = vmatpush3.bf16.msra.mxu1 %v4832_v42  ;;  %4805 = vmatprep.subr.bf16.mxu0 %v4804_v47  ;;  %v1966_v42 = vld [vmem:[#allocation10 + $0x770] sm:$0xff] }
 0x273   :  { %4837 = vmatprep.subr.bf16.mxu1 %v4836_v48  ;;  %v4876_v46 = vpack.c.bf16 %v1967_v43, %v1966_v42 }
 0x275   :  { %4807 = vmatpush3.bf16.msra.mxu0 %v4804_v47  ;;  %v4908_v47 = vpack.c.bf16 %v2061_v45, %v2060_v44 }
 0x276   :  { %4839 = vmatpush3.bf16.msra.mxu1 %v4836_v48  ;;  %4809 = vmatprep.subr.bf16.mxu0 %v4808_v53  ;;  %v2175_v48 = vld [vmem:[#allocation10 + $0xa80] sm:$0xff] }
 0x277   :  { %4841 = vmatprep.subr.bf16.mxu1 %v4840_v54  ;;  %v4913_v52 = vpack.c.bf16 %v2176_v49, %v2175_v48  ;;  %v2334_v48 = vld [vmem:[#allocation10 + $0xb08] sm:$0xff]  ;;  %v2422_v49 = vld [vmem:[#allocation10 + $0xb80] sm:$0xff] }
 0x279   :  { %4811 = vmatpush3.bf16.msra.mxu0 %v4808_v53  ;;  %v5217_v53 = vmov 0.0|0.0  }
 0x27a   :  { %4843 = vmatpush3.bf16.msra.mxu1 %v4840_v54  ;;  %4813 = vmatprep.subr.bf16.mxu0 %v4812_v59  ;;  %v4937_v54 = vpack.c.bf16 %v2158_v51, %v2157_v50  ;;  %v2423_v50 = vld [vmem:[#allocation10 + $0xb88] sm:$0xff] }
 0x27b   :  { %4845 = vmatprep.subr.bf16.mxu1 %v4844_v60 }
 0x27d   :  { %4815 = vmatpush3.bf16.msra.mxu0 %v4812_v59  ;;  %v2160_v59 = vld [vmem:[#allocation10 + $0xa18] sm:$0xff] }
 0x27e   :  { %4847 = vmatpush3.bf16.msra.mxu1 %v4844_v60  ;;  %4849 = vmatprep.subr.bf16.mxu0 %v4848_v2  ;;  %v4916_v60 = vpack.c.bf16 %v2178_v56, %v2177_v55  ;;  %v4940_v61 = vpack.c.bf16 %v2160_v59, %v2159_v58  ;;  %v2336_v55 = vld [vmem:[#allocation10 + $0xb18] sm:$0xff]  ;;  %v2424_v56 = vld [vmem:[#allocation10 + $0xb90] sm:$0xff] }
 0x27f   :  { %4881 = vmatprep.subr.bf16.mxu1 %v4880_v3 }
 0x280   :  { %3920 = vmatmul.mubr.f32.vlgmr.msra.gmra.mrb[4].mxu0 %v1760_v8 }
 0x281   :  { %3955 = vmatmul.mubr.f32.vlgmr.msra.gmra.mrb[4].mxu1 %v1760_v8  ;;  %4851 = vmatpush3.bf16.msra.mxu0 %v4848_v2  ;;  %v4919_v2 = vpack.c.bf16 %v2180_v63, %v2179_v62  ;;  %v2163_v8 = vld [vmem:[#allocation10 + $0xa30] sm:$0xff]  ;;  %v2337_v62 = vld [vmem:[#allocation10 + $0xb20] sm:$0xff]  ;;  %v2338_v63 = vld [vmem:[#allocation10 + $0xb28] sm:$0xff] }
 0x282   :  { %3989 = vmatprep.mubr.f32.mxu0 %v1949_v15  ;;  %4883 = vmatpush3.bf16.msra.mxu1 %v4880_v3  ;;  %v2162_v3 = vld [vmem:[#allocation10 + $0xa28] sm:$0xff] }
 0x283   :  { %4024 = vmatprep.mubr.f32.mxu1 %v1949_v15  ;;  %4853 = vmatprep.subr.bf16.mxu0 %v4852_v9  ;;  %v4943_v4 = vpack.c.bf16 %v2162_v3, %v2161_v1  ;;  %v2166_v15 = vld [vmem:[#allocation10 + $0xa48] sm:$0xff]  ;;  %v2426_v1 = vld [vmem:[#allocation10 + $0xba0] sm:$0xff]  ;;  %v4967_v3 = vpack.c.bf16 %v2338_v63, %v2337_v62 }
 0x284   :  { %4885 = vmatprep.subr.bf16.mxu1 %v4884_v12  ;;  %v2602_v63 = vld [vmem:[#allocation10 + $0xc80] sm:$0xff] }
 0x285   :  { %4855 = vmatpush3.bf16.msra.mxu0 %v4852_v9  ;;  %v2164_v9 = vld [vmem:[#allocation10 + $0xa38] sm:$0xff] }
 0x286   :  { %4887 = vmatpush3.bf16.msra.mxu1 %v4884_v12  ;;  %4857 = vmatprep.subr.bf16.mxu0 %v4856_v16  ;;  %v4946_v10 = vpack.c.bf16 %v2164_v9, %v2163_v8  ;;  %v2184_v12 = vld [vmem:[#allocation10 + $0xac8] sm:$0xff]  ;;  %v2429_v8 = vld [vmem:[#allocation10 + $0xbb8] sm:$0xff]  ;;  %v4970_v9 = vpack.c.bf16 %v2340_v6, %v2339_v5  ;;  %v2606_v6 = vld [vmem:[#allocation10 + $0xca0] sm:$0xff] }
 0x287   :  { %4889 = vmatprep.subr.bf16.mxu1 %v4888_v17  ;;  %v4925_v14 = vpack.c.bf16 %v2184_v12, %v2183_v11  ;;  %v2341_v11 = vld [vmem:[#allocation10 + $0xb40] sm:$0xff]  ;;  %v2342_v12 = vld [vmem:[#allocation10 + $0xb48] sm:$0xff] }
 0x289   :  { %4859 = vmatpush3.bf16.msra.mxu0 %v4856_v16  ;;  %v4949_v16 = vpack.c.bf16 %v2166_v15, %v2165_v13  ;;  %v2430_v13 = vld [vmem:[#allocation10 + $0xbc0] sm:$0xff]  ;;  %v4973_v15 = vpack.c.bf16 %v2342_v12, %v2341_v11  ;;  %v2611_v12 = vld [vmem:[#allocation10 + $0xcc8] sm:$0xff] }
 0x28a   :  { %4891 = vmatpush3.bf16.msra.mxu1 %v4888_v17  ;;  %4861 = vmatprep.subr.bf16.mxu0 %v4860_v22  ;;  %v2185_v17 = vld [vmem:[#allocation10 + $0xad0] sm:$0xff] }
 0x28b   :  { %4893 = vmatprep.subr.bf16.mxu1 %v4892_v23  ;;  %v4928_v20 = vpack.c.bf16 %v2186_v18, %v2185_v17  ;;  %v2343_v17 = vld [vmem:[#allocation10 + $0xb50] sm:$0xff]  ;;  %v2344_v18 = vld [vmem:[#allocation10 + $0xb58] sm:$0xff] }
 0x28d   :  { %4863 = vmatpush3.bf16.msra.mxu0 %v4860_v22  ;;  %v4952_v22 = vpack.c.bf16 %v2168_v21, %v2167_v19  ;;  %v2432_v19 = vld [vmem:[#allocation10 + $0xbd0] sm:$0xff]  ;;  %v4976_v21 = vpack.c.bf16 %v2344_v18, %v2343_v17  ;;  %v2614_v17 = vld [vmem:[#allocation10 + $0xce0] sm:$0xff]  ;;  %v2615_v18 = vld [vmem:[#allocation10 + $0xce8] sm:$0xff] }
 0x28e   :  { %4895 = vmatpush3.bf16.msra.mxu1 %v4892_v23  ;;  %4865 = vmatprep.subr.bf16.mxu0 %v4864_v28  ;;  %v2187_v23 = vld [vmem:[#allocation10 + $0xae0] sm:$0xff] }
 0x28f   :  { %4897 = vmatprep.subr.bf16.mxu1 %v4896_v29  ;;  %v4931_v26 = vpack.c.bf16 %v2188_v24, %v2187_v23  ;;  %v2345_v23 = vld [vmem:[#allocation10 + $0xb60] sm:$0xff]  ;;  %v2346_v24 = vld [vmem:[#allocation10 + $0xb68] sm:$0xff] }
 0x291   :  { %4867 = vmatpush3.bf16.msra.mxu0 %v4864_v28  ;;  %v4955_v28 = vpack.c.bf16 %v2170_v27, %v2169_v25  ;;  %v2434_v25 = vld [vmem:[#allocation10 + $0xbe0] sm:$0xff]  ;;  %v4979_v27 = vpack.c.bf16 %v2346_v24, %v2345_v23  ;;  %v2692_v24 = vld [vmem:[#allocation10 + $0xd08] sm:$0xff] }
 0x292   :  { %4899 = vmatpush3.bf16.msra.mxu1 %v4896_v29  ;;  %4869 = vmatprep.subr.bf16.mxu0 %v4868_v34  ;;  %v2189_v29 = vld [vmem:[#allocation10 + $0xaf0] sm:$0xff]  ;;  %v2691_v23 = vld [vmem:[#allocation10 + $0xd00] sm:$0xff] }
 0x293   :  { %4901 = vmatprep.subr.bf16.mxu1 %v4900_v35  ;;  %v4934_v33 = vpack.c.bf16 %v2190_v30, %v2189_v29  ;;  %v2347_v29 = vld [vmem:[#allocation10 + $0xb70] sm:$0xff]  ;;  %v2348_v30 = vld [vmem:[#allocation10 + $0xb78] sm:$0xff] }
 0x295   :  { %4871 = vmatpush3.bf16.msra.mxu0 %v4868_v34  ;;  %v4958_v34 = vpack.c.bf16 %v2172_v32, %v2171_v31  ;;  %v2436_v31 = vld [vmem:[#allocation10 + $0xbf0] sm:$0xff]  ;;  %v2437_v32 = vld [vmem:[#allocation10 + $0xbf8] sm:$0xff] }
 0x296   :  { %4903 = vmatpush3.bf16.msra.mxu1 %v4900_v35  ;;  %4873 = vmatprep.subr.bf16.mxu0 %v4872_v40 }
 0x297   :  { %4905 = vmatprep.subr.bf16.mxu1 %v4904_v41 }
 0x299   :  { %4875 = vmatpush3.bf16.msra.mxu0 %v4872_v40 }
 0x29a   :  { %4907 = vmatpush3.bf16.msra.mxu1 %v4904_v41  ;;  %4877 = vmatprep.subr.bf16.mxu0 %v4876_v46  ;;  %v2797_v41 = vld [vmem:[#allocation10 + $0xd81] ss:$0 sm:$0xff] }
 0x29b   :  { %4909 = vmatprep.subr.bf16.mxu1 %v4908_v47 }
 0x29d   :  { %4879 = vmatpush3.bf16.msra.mxu0 %v4876_v46 }
 0x29e   :  { %4911 = vmatpush3.bf16.msra.mxu1 %v4908_v47  ;;  %4912 = vmatprep.subr.bf16.mxu0 %v5217_v53  ;;  %v2333_v47 = vld [vmem:[#allocation10 + $0xb00] sm:$0xff] }
 0x29f   :  { %4936 = vmatprep.subr.bf16.mxu1 %v5217_v53  ;;  %v4961_v51 = vpack.c.bf16 %v2334_v48, %v2333_v47  ;;  %v2518_v47 = vld [vmem:[#allocation10 + $0xc38] sm:$0xff] }
 0x2a0   :  { %3990 = vmatmul.mubr.f32.vlgmr.msra.gmra.mrb[4].mxu0 %v1950_v57 }
 0x2a1   :  { %4025 = vmatmul.mubr.f32.vlgmr.msra.gmra.mrb[4].mxu1 %v1950_v57  ;;  %4914 = vmatpush3.bf16.msra.mxu0 %v4913_v52  ;;  %v4985_v52 = vpack.c.bf16 %v2423_v50, %v2422_v49  ;;  %v2425_v57 = vld [vmem:[#allocation10 + $0xb98] sm:$0xff]  ;;  %v2519_v49 = vld [vmem:[#allocation10 + $0xc40] sm:$0xff]  ;;  %v2520_v50 = vld [vmem:[#allocation10 + $0xc48] sm:$0xff] }
 0x2a2   :  { %4938 = vmatpush3.bf16.msra.mxu1 %v4937_v54  ;;  %4915 = vmatprep.subr.bf16.mxu0 %v5217_v53  ;;  %v2335_v54 = vld [vmem:[#allocation10 + $0xb10] sm:$0xff] }
 0x2a3   :  { %4939 = vmatprep.subr.bf16.mxu1 %v5217_v53  ;;  %4059 = vmatprep.mubr.msk.f32.mxu0 %vm5218_vm3, %v5214_v0 }
 0x2a4   :  { %4094 = vmatprep.mubr.msk.f32.mxu1 %vm5218_vm3, %v5214_v0 }
 0x2a5   :  { %4917 = vmatpush3.bf16.msra.mxu0 %v4916_v60  ;;  %v4964_v60 = vpack.c.bf16 %v2336_v55, %v2335_v54  ;;  %v2522_v54 = vld [vmem:[#allocation10 + $0xc58] sm:$0xff] }
 0x2a6   :  { %4941 = vmatpush3.bf16.msra.mxu1 %v4940_v61  ;;  %4918 = vmatprep.subr.bf16.mxu0 %v5217_v53  ;;  %v4988_v61 = vpack.c.bf16 %v2425_v57, %v2424_v56  ;;  %v2523_v56 = vld [vmem:[#allocation10 + $0xc60] sm:$0xff]  ;;  %v2524_v57 = vld [vmem:[#allocation10 + $0xc68] sm:$0xff] }
 0x2a7   :  { %4942 = vmatprep.subr.bf16.mxu1 %v5217_v53 }
 0x2a9   :  { %4920 = vmatpush3.bf16.msra.mxu0 %v4919_v2  ;;  %v2427_v2 = vld [vmem:[#allocation10 + $0xba8] sm:$0xff] }
 0x2aa   :  { %4944 = vmatpush3.bf16.msra.mxu1 %v4943_v4  ;;  %4921 = vmatprep.subr.bf16.mxu0 %v5217_v53  ;;  %v4991_v4 = vpack.c.bf16 %v2427_v2, %v2426_v1  ;;  %v2603_v1 = vld [vmem:[#allocation10 + $0xc88] sm:$0xff]  ;;  %v2604_v2 = vld [vmem:[#allocation10 + $0xc90] sm:$0xff] }
 0x2ab   :  { %4945 = vmatprep.subr.bf16.mxu1 %v5217_v53 }
 0x2ad   :  { %4923 = vmatpush3.bf16.msra.mxu0 %v4922_v7  ;;  %v2428_v7 = vld [vmem:[#allocation10 + $0xbb0] sm:$0xff] }
 0x2ae   :  { %4947 = vmatpush3.bf16.msra.mxu1 %v4946_v10  ;;  %4924 = vmatprep.subr.bf16.mxu0 %v5217_v53  ;;  %v4994_v10 = vpack.c.bf16 %v2429_v8, %v2428_v7  ;;  %v2607_v7 = vld [vmem:[#allocation10 + $0xca8] sm:$0xff] }
 0x2af   :  { %4948 = vmatprep.subr.bf16.mxu1 %v5217_v53  ;;  %v5039_v8 = vpack.c.bf16 %v2607_v7, %v2606_v6  ;;  %v2707_v6 = vld [vmem:[#allocation10 + $0xd84] sm:$0x1] }
 0x2b1   :  { %4926 = vmatpush3.bf16.msra.mxu0 %v4925_v14  ;;  %v2431_v14 = vld [vmem:[#allocation10 + $0xbc8] sm:$0xff] }
 0x2b2   :  { %4950 = vmatpush3.bf16.msra.mxu1 %v4949_v16  ;;  %4927 = vmatprep.subr.bf16.mxu0 %v5217_v53  ;;  %v4997_v16 = vpack.c.bf16 %v2431_v14, %v2430_v13  ;;  %v2612_v14 = vld [vmem:[#allocation10 + $0xcd0] sm:$0xff] }
 0x2b3   :  { %4951 = vmatprep.subr.bf16.mxu1 %v5217_v53 }
 0x2b5   :  { %4929 = vmatpush3.bf16.msra.mxu0 %v4928_v20  ;;  %v2433_v20 = vld [vmem:[#allocation10 + $0xbd8] sm:$0xff] }
 0x2b6   :  { %4953 = vmatpush3.bf16.msra.mxu1 %v4952_v22  ;;  %4930 = vmatprep.subr.bf16.mxu0 %v5217_v53  ;;  %v5000_v22 = vpack.c.bf16 %v2433_v20, %v2432_v19  ;;  %v5051_v19 = vpack.c.bf16 %v2615_v18, %v2614_v17  ;;  %v2616_v20 = vld [vmem:[#allocation10 + $0xcf0] sm:$0xff] }
 0x2b7   :  { %4954 = vmatprep.subr.bf16.mxu1 %v5217_v53 }
 0x2b9   :  { %4932 = vmatpush3.bf16.msra.mxu0 %v4931_v26  ;;  %v2435_v26 = vld [vmem:[#allocation10 + $0xbe8] sm:$0xff] }
 0x2ba   :  { %4956 = vmatpush3.bf16.msra.mxu1 %v4955_v28  ;;  %4933 = vmatprep.subr.bf16.mxu0 %v5217_v53  ;;  %v5003_v28 = vpack.c.bf16 %v2435_v26, %v2434_v25  ;;  %v2693_v25 = vld [vmem:[#allocation10 + $0xd10] sm:$0xff]  ;;  %v5057_v26 = vpack.c.bf16 %v2692_v24, %v2691_v23 }
 0x2bb   :  { %4957 = vmatprep.subr.bf16.mxu1 %v5217_v53 }
 0x2bd   :  { %4935 = vmatpush3.bf16.msra.mxu0 %v4934_v33  ;;  %v4982_v33 = vpack.c.bf16 %v2348_v30, %v2347_v29  ;;  %v2695_v29 = vld [vmem:[#allocation10 + $0xd20] sm:$0xff]  ;;  %v2696_v30 = vld [vmem:[#allocation10 + $0xd28] sm:$0xff] }
 0x2be   :  { %4959 = vmatpush3.bf16.msra.mxu1 %v4958_v34  ;;  %4960 = vmatprep.subr.bf16.mxu0 %v5217_v53  ;;  %v5006_v34 = vpack.c.bf16 %v2437_v32, %v2436_v31  ;;  %v5063_v31 = vpack.c.bf16 %v2696_v30, %v2695_v29  ;;  %v2697_v32 = vld [vmem:[#allocation10 + $0xd30] sm:$0xff] }
 0x2bf   :  { %4984 = vmatprep.subr.bf16.mxu1 %v5217_v53 }
 0x373   :  { %v3991_v35 = vpop.f32.mrb[4].mxu0 }
 0x374   :  { %v4026_v36 = vpop.f32.mrb[4].mxu1  ;;  %v2034_v37 = vpop.f32.mrb[5].mxu0 }
 0x375   :  { %v2140_v38 = vmax.f32 %v3991_v35, %v4026_v36  ;;  %v2128_v39 = vpop.f32.mrb[5].mxu1  ;;  %v2511_v35 = vld [vmem:[#allocation10 + $0xc00] sm:$0xff]  ;;  %v2512_v36 = vld [vmem:[#allocation10 + $0xc08] sm:$0xff] }
 0x376   :  { %v2139_v40 = vmax.f32 %v2034_v37, %v2128_v39  ;;  %v5009_v37 = vpack.c.bf16 %v2512_v36, %v2511_v35  ;;  %v2514_v39 = vld [vmem:[#allocation10 + $0xc18] sm:$0xff]  ;;  %v2699_v35 = vld [vmem:[#allocation10 + $0xd40] sm:$0xff]  ;;  %v2700_v36 = vld [vmem:[#allocation10 + $0xd48] sm:$0xff] }
 0x377   :  { %2142 = vst [vmem:[#allocation5 + $0x8] sm:$0x3] %v2140_v38  ;;  %v2513_v38 = vld [vmem:[#allocation10 + $0xc10] sm:$0xff] }
 0x378   :  { %2141 = vst [vmem:[#allocation5] sm:$0xff] %v2139_v40 }
 0x37f   :  { %v2144_v42 = vld [vmem:[#allocation5] ss:$2 sm:$0x1f]  ;;  %v2146_v43 = vld [vmem:[#allocation5 + $0x1] ss:$2 sm:$0x1f] }
 0x380   :  { %v2147_v44 = vmax.f32 %v2144_v42, %v2146_v43  ;;  %v5012_v42 = vpack.c.bf16 %v2514_v39, %v2513_v38  ;;  %v2515_v43 = vld [vmem:[#allocation10 + $0xc20] sm:$0xff]  ;;  %v2701_v38 = vld [vmem:[#allocation10 + $0xd50] sm:$0xff]  ;;  %v2702_v39 = vld [vmem:[#allocation10 + $0xd58] sm:$0xff] }
 0x382   :  { %v2152_v45 = vadd.f32 %v2797_v41, %v2147_v44  ;;  %v2516_v44 = vld [vmem:[#allocation10 + $0xc28] sm:$0xff] }
 0x384   :  { %v2153_v46 = vmax.f32 %v2152_v45, 0.0  ;;  %v5015_v45 = vpack.c.bf16 %v2516_v44, %v2515_v43 }
 0x386   :  { %2154 = vst [vmem:[#allocation6] sm:$0x1f] %v2153_v46  ;;  %v2517_v46 = vld [vmem:[#allocation10 + $0xc30] sm:$0xff] }
 0x387   :  { %v5018_v48 = vpack.c.bf16 %v2518_v47, %v2517_v46 }
 0x38d   :  { %v2173_v58 = vld [vmem:[#allocation6 + $0x1] sm:$0x1]  ;;  %v2155_v59 = vld [vmem:[#allocation6] sm:$0x1]  ;;  %v2331_v40 = vld [vmem:[#allocation6 + $0x2] sm:$0x1] }
 0x38e   :  { %4060 = vmatmul.mubr.f32.vlgmr.msra.gmra.mrb[6].mxu0 %v2173_v58  ;;  %4095 = vmatmul.mubr.f32.vlgmr.msra.gmra.mrb[6].mxu1 %v2155_v59  ;;  %v2420_v41 = vld [vmem:[#allocation6 + $0x3] sm:$0x1]  ;;  %v5027_v58 = vpack.c.bf16 %v2524_v57, %v2523_v56  ;;  %v2525_v59 = vld [vmem:[#allocation10 + $0xc70] sm:$0xff]  ;;  %v2509_v62 = vld [vmem:[#allocation6 + $0x4] sm:$0x1] }
 0x38f   :  { %4962 = vmatpush3.bf16.msra.mxu0 %v4961_v51  ;;  %4986 = vmatpush3.bf16.msra.mxu1 %v4985_v52  ;;  %v5021_v51 = vpack.c.bf16 %v2520_v50, %v2519_v49  ;;  %v2521_v52 = vld [vmem:[#allocation10 + $0xc50] sm:$0xff]  ;;  %v2598_v57 = vld [vmem:[#allocation10 + $0xd82] sm:$0x1] }
 0x390   :  { %4963 = vmatprep.subr.bf16.mxu0 %v5217_v53  ;;  %4987 = vmatprep.subr.bf16.mxu1 %v5217_v53  ;;  %v5024_v55 = vpack.c.bf16 %v2522_v54, %v2521_v52 }
 0x391   :  { %4129 = vmatprep.mubr.msk.f32.mxu0 %vm5218_vm3, %v5214_v0  ;;  %4164 = vmatprep.mubr.msk.f32.mxu1 %vm5218_vm3, %v5214_v0 }
 0x393   :  { %4965 = vmatpush3.bf16.msra.mxu0 %v4964_v60  ;;  %4989 = vmatpush3.bf16.msra.mxu1 %v4988_v61  ;;  %v2526_v60 = vld [vmem:[#allocation10 + $0xc78] sm:$0xff] }
 0x394   :  { %4966 = vmatprep.subr.bf16.mxu0 %v5217_v53  ;;  %4990 = vmatprep.subr.bf16.mxu1 %v5217_v53  ;;  %v5030_v61 = vpack.c.bf16 %v2526_v60, %v2525_v59 }
 0x397   :  { %4968 = vmatpush3.bf16.msra.mxu0 %v4967_v3  ;;  %4992 = vmatpush3.bf16.msra.mxu1 %v4991_v4  ;;  %v5033_v3 = vpack.c.bf16 %v2603_v1, %v2602_v63  ;;  %v2605_v4 = vld [vmem:[#allocation10 + $0xc98] sm:$0xff]  ;;  %v2618_v1 = vld [vmem:[#allocation10 + $0xd83] sm:$0x1] }
 0x398   :  { %4969 = vmatprep.subr.bf16.mxu0 %v5217_v53  ;;  %4993 = vmatprep.subr.bf16.mxu1 %v5217_v53  ;;  %v5036_v5 = vpack.c.bf16 %v2605_v4, %v2604_v2 }
 0x39b   :  { %4971 = vmatpush3.bf16.msra.mxu0 %v4970_v9  ;;  %4995 = vmatpush3.bf16.msra.mxu1 %v4994_v10  ;;  %v2608_v9 = vld [vmem:[#allocation10 + $0xcb0] sm:$0xff]  ;;  %v2609_v10 = vld [vmem:[#allocation10 + $0xcb8] sm:$0xff] }
 0x39c   :  { %4972 = vmatprep.subr.bf16.mxu0 %v5217_v53  ;;  %4996 = vmatprep.subr.bf16.mxu1 %v5217_v53  ;;  %v5042_v11 = vpack.c.bf16 %v2609_v10, %v2608_v9 }
 0x39f   :  { %4974 = vmatpush3.bf16.msra.mxu0 %v4973_v15  ;;  %4998 = vmatpush3.bf16.msra.mxu1 %v4997_v16  ;;  %v2613_v15 = vld [vmem:[#allocation10 + $0xcd8] sm:$0xff] }
 0x3a0   :  { %4975 = vmatprep.subr.bf16.mxu0 %v5217_v53  ;;  %4999 = vmatprep.subr.bf16.mxu1 %v5217_v53  ;;  %v5048_v16 = vpack.c.bf16 %v2613_v15, %v2612_v14 }
 0x3a3   :  { %4977 = vmatpush3.bf16.msra.mxu0 %v4976_v21  ;;  %5001 = vmatpush3.bf16.msra.mxu1 %v5000_v22  ;;  %v2617_v21 = vld [vmem:[#allocation10 + $0xcf8] sm:$0xff] }
 0x3a4   :  { %4978 = vmatprep.subr.bf16.mxu0 %v5217_v53  ;;  %5002 = vmatprep.subr.bf16.mxu1 %v5217_v53  ;;  %v5054_v22 = vpack.c.bf16 %v2617_v21, %v2616_v20 }
 0x3a7   :  { %4980 = vmatpush3.bf16.msra.mxu0 %v4979_v27  ;;  %5004 = vmatpush3.bf16.msra.mxu1 %v5003_v28  ;;  %v2694_v27 = vld [vmem:[#allocation10 + $0xd18] sm:$0xff] }
 0x3a8   :  { %4981 = vmatprep.subr.bf16.mxu0 %v5217_v53  ;;  %5005 = vmatprep.subr.bf16.mxu1 %v5217_v53  ;;  %v5060_v28 = vpack.c.bf16 %v2694_v27, %v2693_v25 }
 0x3ab   :  { %4983 = vmatpush3.bf16.msra.mxu0 %v4982_v33  ;;  %5007 = vmatpush3.bf16.msra.mxu1 %v5006_v34  ;;  %v2698_v33 = vld [vmem:[#allocation10 + $0xd38] sm:$0xff] }
 0x3ac   :  { %5008 = vmatprep.subr.bf16.mxu0 %v5217_v53  ;;  %5032 = vmatprep.subr.bf16.mxu1 %v5217_v53  ;;  %v5066_v34 = vpack.c.bf16 %v2698_v33, %v2697_v32 }
 0x3ae   :  { %4130 = vmatmul.mubr.f32.vlgmr.msra.gmra.mrb[8].mxu0 %v2331_v40  ;;  %4165 = vmatmul.mubr.f32.vlgmr.msra.gmra.mrb[8].mxu1 %v2420_v41  ;;  %v5072_v40 = vpack.c.bf16 %v2702_v39, %v2701_v38  ;;  %v2703_v41 = vld [vmem:[#allocation10 + $0xd60] sm:$0xff] }
 0x3af   :  { %5010 = vmatpush3.bf16.msra.mxu0 %v5009_v37  ;;  %4199 = vmatprep.mubr.msk.f32.mxu0 %vm5218_vm3, %v5214_v0  ;;  %v5069_v37 = vpack.c.bf16 %v2700_v36, %v2699_v35 }
 0x3b0   :  { %5011 = vmatprep.subr.bf16.mxu0 %v5217_v53  ;;  %4234 = vmatprep.mubr.msk.f32.mxu1 %vm5218_vm3, %v5214_v0 }
 0x3b1   :  { %5034 = vmatpush3.bf16.msra.mxu1 %v5033_v3 }
 0x3b2   :  { %5035 = vmatprep.subr.bf16.mxu1 %v5217_v53 }
 0x3b3   :  { %5013 = vmatpush3.bf16.msra.mxu0 %v5012_v42  ;;  %v2704_v42 = vld [vmem:[#allocation10 + $0xd68] sm:$0xff] }
 0x3b4   :  { %5014 = vmatprep.subr.bf16.mxu0 %v5217_v53  ;;  %v5075_v43 = vpack.c.bf16 %v2704_v42, %v2703_v41 }
 0x3b5   :  { %5037 = vmatpush3.bf16.msra.mxu1 %v5036_v5 }
 0x3b6   :  { %5038 = vmatprep.subr.bf16.mxu1 %v5217_v53 }
 0x3b7   :  { %5016 = vmatpush3.bf16.msra.mxu0 %v5015_v45 }
 0x3b8   :  { %5017 = vmatprep.subr.bf16.mxu0 %v5217_v53 }
 0x3b9   :  { %5040 = vmatpush3.bf16.msra.mxu1 %v5039_v8 }
 0x3ba   :  { %5041 = vmatprep.subr.bf16.mxu1 %v5217_v53 }
 0x3bb   :  { %5019 = vmatpush3.bf16.msra.mxu0 %v5018_v48 }
 0x3bc   :  { %5020 = vmatprep.subr.bf16.mxu0 %v5217_v53 }
 0x3bd   :  { %5043 = vmatpush3.bf16.msra.mxu1 %v5042_v11 }
 0x3be   :  { %5044 = vmatprep.subr.bf16.mxu1 %v5217_v53 }
 0x3bf   :  { %5022 = vmatpush3.bf16.msra.mxu0 %v5021_v51 }
 0x3c0   :  { %5023 = vmatprep.subr.bf16.mxu0 %v5217_v53 }
 0x3c3   :  { %5025 = vmatpush3.bf16.msra.mxu0 %v5024_v55 }
 0x3c4   :  { %5026 = vmatprep.subr.bf16.mxu0 %v5217_v53 }
 0x3c7   :  { %5028 = vmatpush3.bf16.msra.mxu0 %v5027_v58 }
 0x3c8   :  { %5029 = vmatprep.subr.bf16.mxu0 %v5217_v53 }
 0x3cb   :  { %5031 = vmatpush3.bf16.msra.mxu0 %v5030_v61 }
 0x3cc   :  { %5056 = vmatprep.subr.bf16.mxu0 %v5217_v53 }
 0x3ce   :  { %4200 = vmatmul.mubr.f32.vlgmr.msra.gmra.mrb[10].mxu0 %v2509_v62  ;;  %v2705_v62 = vld [vmem:[#allocation10 + $0xd70] sm:$0xff] }
 0x3cf   :  { %4269 = vmatprep.mubr.msk.f32.mxu0 %vm5218_vm3, %v5214_v0  ;;  %v2610_v0 = vld [vmem:[#allocation10 + $0xcc0] sm:$0xff]  ;;  %5058 = vmatpush3.bf16.msra.mxu0 %v5057_v26 }
 0x3d0   :  { %v5045_v13 = vpack.c.bf16 %v2611_v12, %v2610_v0  ;;  %5059 = vmatprep.subr.bf16.mxu0 %v5217_v53 }
 0x3d2   :  { %5046 = vmatpush3.bf16.msra.mxu1 %v5045_v13 }
 0x3d3   :  { %5047 = vmatprep.subr.bf16.mxu1 %v5217_v53  ;;  %5061 = vmatpush3.bf16.msra.mxu0 %v5060_v28 }
 0x3d4   :  { %5062 = vmatprep.subr.bf16.mxu0 %v5217_v53 }
 0x3d6   :  { %5049 = vmatpush3.bf16.msra.mxu1 %v5048_v16 }
 0x3d7   :  { %5050 = vmatprep.subr.bf16.mxu1 %v5217_v53  ;;  %5064 = vmatpush3.bf16.msra.mxu0 %v5063_v31 }
 0x3d8   :  { %5065 = vmatprep.subr.bf16.mxu0 %v5217_v53 }
 0x3da   :  { %5052 = vmatpush3.bf16.msra.mxu1 %v5051_v19 }
 0x3db   :  { %5053 = vmatprep.subr.bf16.mxu1 %v5217_v53  ;;  %5067 = vmatpush3.bf16.msra.mxu0 %v5066_v34 }
 0x3dc   :  { %5068 = vmatprep.subr.bf16.mxu0 %v5217_v53 }
 0x3de   :  { %5055 = vmatpush3.bf16.msra.mxu1 %v5054_v22 }
 0x3df   :  { %5070 = vmatpush3.bf16.msra.mxu0 %v5069_v37 }
 0x3e0   :  { %5071 = vmatprep.subr.bf16.mxu0 %v5217_v53 }
 0x3e3   :  { %5073 = vmatpush3.bf16.msra.mxu0 %v5072_v40 }
 0x3e4   :  { %5074 = vmatprep.subr.bf16.mxu0 %v5217_v53 }
 0x3e7   :  { %5076 = vmatpush3.bf16.msra.mxu0 %v5075_v43 }
 0x3e8   :  { %5077 = vmatprep.subr.bf16.mxu0 %v5217_v53  ;;  %v2706_v53 = vld [vmem:[#allocation10 + $0xd78] sm:$0xff] }
 0x3e9   :  { %v5078_v63 = vpack.c.bf16 %v2706_v53, %v2705_v62 }
 0x3eb   :  { %5079 = vmatpush3.bf16.msra.mxu0 %v5078_v63 }
 0x461   :  { %v2257_v44 = vpop.f32.mrb[6].mxu0  ;;  %v2327_v45 = vpop.f32.mrb[6].mxu1 }
 0x462   :  { %v2328_v46 = vadd.f32 %v2327_v45, %v2257_v44  ;;  %v4061_v47 = vpop.f32.mrb[7].mxu0  ;;  %v4096_v48 = vpop.f32.mrb[7].mxu1 }
 0x481   :  { %v2415_v49 = vpop.f32.mrb[8].mxu0  ;;  %v2504_v50 = vpop.f32.mrb[8].mxu1 }
 0x482   :  { %v2419_v51 = vadd.f32 %v2415_v49, %v2328_v46  ;;  %v4131_v52 = vpop.f32.mrb[9].mxu0  ;;  %v4166_v54 = vpop.f32.mrb[9].mxu1 }
 0x484   :  { %v2508_v55 = vadd.f32 %v2504_v50, %v2419_v51 }
 0x4a1   :  { %v2593_v56 = vpop.f32.mrb[10].mxu0 }
 0x4a2   :  { %v2597_v58 = vadd.f32 %v2593_v56, %v2508_v55  ;;  %v4201_v59 = vpop.f32.mrb[11].mxu0 }
 0x4a4   :  { %v2599_v60 = vadd.f32 %v2598_v57, %v2597_v58 }
 0x4a6   :  { %v2600_v61 = vmax.f32 %v2599_v60, 0.0 }
 0x4a8   :  { %4235 = vmatmul.mubr.f32.vlgmr.msra.gmra.mrb[10].mxu1 %v2600_v61 }
 0x57b   :  { %v2685_v2 = vpop.f32.mrb[10].mxu1 }
 0x57c   :  { %v2686_v3 = vadd.f32 %v2685_v2, %v2618_v1  ;;  %v4236_v4 = vpop.f32.mrb[11].mxu1 }
 0x57e   :  { %v2689_v5 = vmax.f32 %v2686_v3, 0.0 }
 0x580   :  { %4270 = vmatmul.mubr.f32.vlgmr.msra.gmra.mrb[12].mxu0 %v2689_v5 }
 0x653   :  { %v2774_v7 = vpop.f32.mrb[12].mxu0 }
 0x654   :  { %v2775_v8 = vadd.f32 %v2774_v7, %v2707_v6  ;;  %v4271_v9 = vpop.f32.mrb[13].mxu0 }
 0x656   :  { %2779 = vst.msk [vmem:[#allocation12] sm:$0x1] %vm2778_vm4, %v2775_v8 }
 0x657   :  { %5193 = shalt.err (!%p5190_p6)
}
 0x658   :  { %s5194_s13 = scalar_lea.hbm %s5367_s2, 16 }
 0x659   :  { %p5195_p7 = scmp.ne.s32.totalorder %s5367_s2, %s5194_s13  ;;  %p5198_p8 = scmp.lt.u32.totalorder %s5194_s13, %s5367_s2 }
 0x65b   :  { %p5200_p9 = pnand %p5198_p8, %p5195_p7 }
 0x65d   :  { %5203 = shalt.err (!%p5200_p9)
}
 0x65e   :  { %2789 = dma.vmem_to_hbm [thread:$0]  %s2787_s8, 16, %s5367_s2, [#allocation9]  }
 0x65f   :  { %5208 = dma.done.wait [#allocation9], 16  }
 0x660   :  { %5209 = vsyncadd [#allocation9], 4294967280 }
 0x661   :  { %2793 = vsyncpa [#allocation8], 1 }
 0x662   :  { %2794 = vsyncpa [#allocation11], 1 }
 0x663   :  { %2795 = vsyncpa [#allocation9], 1 }

</bundles_post_ra>
